<compile_context>
chip_gen: v5e
topology: v5e:2x2
jax: 0.10.0
libtpu: 0.0.40
codegen_flags: <defaults>
</compile_context>

<pallas_src>
import functools

import jax
import jax.numpy as jnp
import numpy as np
from jax.experimental import pallas as pl
from jax.experimental.pallas import tpu as pltpu


def _round_up(a, b):
    return -(-a // b) * b


def _wgrid(n_w, c):
    """# of width positions per row so that (width * channels) lanes are dense."""
    granule = 128 if 128 % c == 0 else 8 * c
    return _round_up(n_w * c, granule) // c


# ---------------------------------------------------------------------------
# kernel: one batch element per grid step
# ---------------------------------------------------------------------------
def _resblock3d_kernel(x_ref, w1_ref, w2_ref, wsc_ref, b1_ref, b2_ref,
                       out_ref, h1_ref, *, hp, r1, r2, lx, d_out, h_out):
    """x_ref  : (1, Rx, 3*Lx) bf16 - lane groups = [x_pad[r], x_pad[r+1], x_pad[r+2]],
                each group laid out as (w, cin).
       out_ref: (1, D*H, Lo) f32  - rows = compact (d, h), lanes = (w, cout).
       h1_ref : (R1, 2*L1) bf16 scratch - conv1 output at rows r and r+1 side by
                side in lanes (so conv2's kh taps need no row shift)."""
    # ---- conv1 + BN1(scale pre-folded) + ReLU: 2 MXU calls, K = 3*Lx ----
    acc1 = jnp.dot(x_ref[0, 0:r1, :], w1_ref[0],
                   preferred_element_type=jnp.float32)
    acc1 = acc1 + jnp.dot(x_ref[0, hp:hp + r1, :], w1_ref[1],
                          preferred_element_type=jnp.float32)
    h1_ref[...] = jnp.maximum(acc1 + b1_ref[...], 0.0).astype(jnp.bfloat16)

    # ---- conv2 + BN2(scale pre-folded): 2 MXU calls, K = 2*L1 ----
    acc2 = jnp.dot(h1_ref[0:r2, :], w2_ref[0],
                   preferred_element_type=jnp.float32)
    acc2 = acc2 + jnp.dot(h1_ref[hp:hp + r2, :], w2_ref[1],
                          preferred_element_type=jnp.float32)

    # ---- shortcut 1x1x1 conv + BN(scale pre-folded): lane group 1 of x at row
    #      r+hp is x_pad[r+hp+1], i.e. exactly the (d+1, h+1) centre tap. ----
    acc2 = acc2 + jnp.dot(x_ref[0, hp:hp + r2, lx:2 * lx], wsc_ref[...],
                          preferred_element_type=jnp.float32)

    out = jnp.maximum(acc2 + b2_ref[...], 0.0)        # (r2, Lo) f32

    # compact, lane-dense store: keep the h_out valid h-rows of each hp-row
    # depth slice (all offsets sublane aligned).
    for d in range(d_out):
        out_ref[0, d * h_out:(d + 1) * h_out, :] = (
            out[d * hp:d * hp + h_out, :].astype(out_ref.dtype))


# ---------------------------------------------------------------------------
# wrapper-side operand construction (one-time, numpy)
# ---------------------------------------------------------------------------
def _fold_bn(p, eps=1e-5):
    g = np.asarray(p["gamma"], np.float32)
    b = np.asarray(p["beta"], np.float32)
    m = np.asarray(p["mean"], np.float32)
    v = np.asarray(p["var"], np.float32)
    s = g / np.sqrt(v + eps)
    return s, b - m * s


def _build_operands(params, *, Cin, Cout, W, Wx, W1g, Wog):
    Lx, L1, Lo = Wx * Cin, W1g * Cout, Wog * Cout

    s1, b1 = _fold_bn(params["bn1"])
    s2, b2 = _fold_bn(params["bn2"])
    ssc, bsc = _fold_bn(params["bnsc"])

    w1 = np.asarray(params["w1"], np.float32) * s1[:, None, None, None, None]
    w2 = np.asarray(params["w2"], np.float32) * s2[:, None, None, None, None]
    wsc = np.asarray(params["wsc"], np.float32)[:, :, 0, 0, 0] * ssc[:, None]

    # conv1 band: (kd, [x_pad[r+g] groups g=0..2] x (w,cin))
    #             -> ([conv1 @ row r, row r+1] x (w,cout))
    w1b = np.zeros((2, 3 * Lx, 2 * L1), np.float32)
    for kd in range(2):
        for j in range(2):              # output half: conv1 at row r + j
            for kh in range(2):
                g = j + kh              # input lane group
                for kw in range(2):
                    blk = w1[:, :, kd, kh, kw].T            # (Cin, Cout)
                    for wo in range(W + 1):                 # valid conv1 w outputs
                        wi = wo + kw
                        w1b[kd,
                            g * Lx + wi * Cin:g * Lx + (wi + 1) * Cin,
                            j * L1 + wo * Cout:j * L1 + (wo + 1) * Cout] = blk

    # conv2 band: (kd, [h1 @ row r, row r+1] x (w,cout)) -> (w,cout)
    w2b = np.zeros((2, 2 * L1, Lo), np.float32)
    for kd in range(2):
        for kh in range(2):
            for kw in range(2):
                blk = w2[:, :, kd, kh, kw].T                # (Cout, Cout)
                for wo in range(W):
                    wi = wo + kw
                    w2b[kd,
                        kh * L1 + wi * Cout:kh * L1 + (wi + 1) * Cout,
                        wo * Cout:(wo + 1) * Cout] = blk

    # shortcut 1x1x1 band: x_pad (w+1, cin) -> (w, cout)  (the +1 row shift is
    # handled in-kernel by reading lane group 1 at row r+hp).
    wscb = np.zeros((Lx, Lo), np.float32)
    for wo in range(W):
        wscb[(wo + 1) * Cin:(wo + 2) * Cin,
             wo * Cout:(wo + 1) * Cout] = wsc.T

    b1_row = np.tile(b1, 2 * W1g).reshape(1, 2 * L1)
    b2_row = np.tile(b2 + bsc, Wog).reshape(1, Lo)

    return (jnp.asarray(w1b, jnp.bfloat16), jnp.asarray(w2b, jnp.bfloat16),
            jnp.asarray(wscb, jnp.bfloat16),
            jnp.asarray(b1_row, jnp.float32), jnp.asarray(b2_row, jnp.float32))


# ---------------------------------------------------------------------------
# public entry point
# ---------------------------------------------------------------------------
def residual_block3d(x, params):
    """x: (N, Cin, D, H, W) f32 -> (N, Cout, D, H, W) f32 (NCDHW, like PyTorch)."""
    N, Cin, D, H, W = x.shape
    Cout = params["w1"].shape[0]

    Hp = _round_up(H + 2, 8)            # padded height -> aligned kd row shifts
    Wx = _wgrid(W + 2, Cin)             # x lane w-grid
    W1g = _wgrid(W + 1, Cout)           # conv1-output lane w-grid
    Wog = _wgrid(W, Cout)               # output lane w-grid
    Lx, L1, Lo = Wx * Cin, W1g * Cout, Wog * Cout

    R2 = D * Hp                         # conv2 rows computed (padded (d,h) grid)
    R1 = _round_up(R2 + Hp + 1, 16)     # conv1 rows needed (16-aligned, bf16 tiles)
    Dx = -(-(R1 + Hp) // Hp)            # depth slices of the zero-padded x slab
    Rx = Dx * Hp                        # >= R1 + Hp : every kernel slice in-bounds

    # layout prep: zero-padded NDHWC volume, flattened (d,h) rows, (w,c) lanes,
    # plus +1 / +2 row-shifted lane groups (so kh taps are weight-side only).
    x_ndhwc = jnp.transpose(x, (0, 2, 3, 4, 1)).astype(jnp.float32)
    xp = jnp.zeros((N, Dx, Hp, Wx, Cin), jnp.float32)
    xp = xp.at[:, 1:D + 1, 1:H + 1, 1:W + 1, :].set(x_ndhwc)
    x_flat = xp.reshape(N, Rx, Lx)
    zrow = jnp.zeros((N, 1, Lx), jnp.float32)
    x_sh1 = jnp.concatenate([x_flat[:, 1:, :], zrow], axis=1)
    x_sh2 = jnp.concatenate([x_flat[:, 2:, :], zrow, zrow], axis=1)
    x_cat = jnp.concatenate([x_flat, x_sh1, x_sh2], axis=-1).astype(jnp.bfloat16)

    w1b, w2b, wscb, b1_row, b2_row = _build_operands(
        params, Cin=Cin, Cout=Cout, W=W, Wx=Wx, W1g=W1g, Wog=Wog)

    kernel = functools.partial(_resblock3d_kernel, hp=Hp, r1=R1, r2=R2,
                               lx=Lx, d_out=D, h_out=H)

    # VMEM budget: real footprint (+ headroom), capped well below v7x's 64 MiB.
    footprint = (2 * Rx * 3 * Lx * 2                 # double-buffered x block (bf16)
                 + 2 * D * H * Lo * 4                # double-buffered out block (f32)
                 + (w1b.size + w2b.size + wscb.size) * 2
                 + (R1 * 2 * L1 * (4 + 2) + R2 * Lo * 4) * 2)   # acc1/h1/acc2
    vmem_limit = int(min(48 * 2**20, max(16 * 2**20, 2 * footprint)))

    rep2 = lambda n: (0, 0)
    rep3 = lambda n: (0, 0, 0)

    out_flat = pl.pallas_call(
        kernel,
        out_shape=jax.ShapeDtypeStruct((N, D * H, Lo), jnp.float32),
        grid_spec=pltpu.PrefetchScalarGridSpec(
            num_scalar_prefetch=0,
            grid=(N,),
            in_specs=[
                pl.BlockSpec((1, Rx, 3 * Lx), lambda n: (n, 0, 0)),   # x
                pl.BlockSpec((2, 3 * Lx, 2 * L1), rep3),              # conv1 band
                pl.BlockSpec((2, 2 * L1, Lo), rep3),                  # conv2 band
                pl.BlockSpec((Lx, Lo), rep2),                         # shortcut band
                pl.BlockSpec((1, 2 * L1), rep2),                      # bias1
                pl.BlockSpec((1, Lo), rep2),                          # bias2 + bias_sc
            ],
            out_specs=pl.BlockSpec((1, D * H, Lo), lambda n: (n, 0, 0)),
            scratch_shapes=[pltpu.VMEM((R1, 2 * L1), jnp.bfloat16)],
        ),
        compiler_params=pltpu.CompilerParams(
            dimension_semantics=("parallel",),        # batch across TensorCores
            vmem_limit_bytes=vmem_limit),
    )(x_cat, w1b, w2b, wscb, b1_row, b2_row)

    out = out_flat.reshape(N, D, H, Wog, Cout)[:, :, :, :W, :]
    return jnp.transpose(out, (0, 4, 1, 2, 3))        # back to NCDHW


# ---------------------------------------------------------------------------
# pure-JAX (XLA) reference replicating the PyTorch forward (BN in eval mode)
# ---------------------------------------------------------------------------
def reference(x, params):
    dn = ('NCDHW', 'OIDHW', 'NCDHW')

    def conv(x_, w, pad):
        return jax.lax.conv_general_dilated(
            x_, w, (1, 1, 1), [(pad, pad)] * 3, dimension_numbers=dn,
            precision=jax.lax.Precision.HIGHEST)

    def bn(x_, p):
        s = p["gamma"] / jnp.sqrt(p["var"] + 1e-5)
        b = p["beta"] - p["mean"] * s
        return x_ * s[None, :, None, None, None] + b[None, :, None, None, None]

    y = conv(x, params["w1"], 1)
    y = jnp.maximum(bn(y, params["bn1"]), 0.0)
    y = conv(y, params["w2"], 0)
    y = bn(y, params["bn2"])
    sc = bn(conv(x, params["wsc"], 0), params["bnsc"])
    return jnp.maximum(y + sc, 0.0)


if __name__ == "__main__":
    key = jax.random.PRNGKey(0)
    N, Cin, Cout, D, H, W = 2, 4, 8, 8, 8, 8
    ks = jax.random.split(key, 7)
    x = jax.random.normal(ks[0], (N, Cin, D, H, W), jnp.float32)

    def bn_params(k):
        k1, k2, k3, k4 = jax.random.split(k, 4)
        return {"gamma": jax.random.uniform(k1, (Cout,), jnp.float32, 0.5, 1.5),
                "beta": 0.1 * jax.random.normal(k2, (Cout,), jnp.float32),
                "mean": 0.1 * jax.random.normal(k3, (Cout,), jnp.float32),
                "var": jax.random.uniform(k4, (Cout,), jnp.float32, 0.5, 1.5)}

    params = {
        "w1": 0.1 * jax.random.normal(ks[1], (Cout, Cin, 2, 2, 2), jnp.float32),
        "w2": 0.1 * jax.random.normal(ks[2], (Cout, Cout, 2, 2, 2), jnp.float32),
        "wsc": 0.1 * jax.random.normal(ks[3], (Cout, Cin, 1, 1, 1), jnp.float32),
        "bn1": bn_params(ks[4]),
        "bn2": bn_params(ks[5]),
        "bnsc": bn_params(ks[6]),
    }

    out = jax.block_until_ready(residual_block3d(x, params))
    ref = jax.block_until_ready(reference(x, params))
    assert out.shape == (N, Cout, D, H, W)
    # bf16 MXU operands (f32 accumulation) -> slightly looser tolerance than pure f32.
    np.testing.assert_allclose(np.asarray(out), np.asarray(ref), rtol=3e-2, atol=3e-2)
    print("KERNEL_OK")
</pallas_src>

<mosaic_0001>
module attributes {stable_mosaic.version = 11 : i64} {
  func.func @_resblock3d_kernel(%arg0: i32, %arg1: memref<1x176x384xbf16, #tpu.memory_space<vmem>>, %arg2: memref<2x384x256xbf16, #tpu.memory_space<vmem>>, %arg3: memref<2x256x128xbf16, #tpu.memory_space<vmem>>, %arg4: memref<128x128xbf16, #tpu.memory_space<vmem>>, %arg5: memref<1x256xf32, #tpu.memory_space<vmem>>, %arg6: memref<1x128xf32, #tpu.memory_space<vmem>>, %arg7: memref<1x64x128xf32, #tpu.memory_space<vmem>>, %arg8: memref<160x256xbf16, #tpu.memory_space<vmem>>) attributes {dimension_semantics = [#tpu.dimension_semantics<parallel>], iteration_bounds = array<i64: 2>, scalar_prefetch = 0 : i64, scratch_operands = 1 : i64, tpu.core_type = #tpu.core_type<tc>, window_params = [{transform_indices = @transform_0, window_bounds = array<i64: 1, 176, 384>}, {pipeline_mode = #tpu.pipeline_mode<synchronous>, transform_indices = @transform_1, window_bounds = array<i64: 2, 384, 256>}, {pipeline_mode = #tpu.pipeline_mode<synchronous>, transform_indices = @transform_2, window_bounds = array<i64: 2, 256, 128>}, {pipeline_mode = #tpu.pipeline_mode<synchronous>, transform_indices = @transform_3, window_bounds = array<i64: 128, 128>}, {pipeline_mode = #tpu.pipeline_mode<synchronous>, transform_indices = @transform_4, window_bounds = array<i64: 1, 256>}, {pipeline_mode = #tpu.pipeline_mode<synchronous>, transform_indices = @transform_5, window_bounds = array<i64: 1, 128>}, {transform_indices = @transform_6, window_bounds = array<i64: 1, 64, 128>}]} {
    %c0 = arith.constant 0 : index
    %c0_0 = arith.constant 0 : index
    %c0_1 = arith.constant 0 : index
    %0 = vector.load %arg1[%c0, %c0_0, %c0_1] : memref<1x176x384xbf16, #tpu.memory_space<vmem>>, vector<1x160x384xbf16>
    %1 = vector.shape_cast %0 : vector<1x160x384xbf16> to vector<160x384xbf16>
    %c0_2 = arith.constant 0 : index
    %c0_3 = arith.constant 0 : index
    %c0_4 = arith.constant 0 : index
    %2 = vector.load %arg2[%c0_2, %c0_3, %c0_4] : memref<2x384x256xbf16, #tpu.memory_space<vmem>>, vector<1x384x256xbf16>
    %3 = vector.shape_cast %2 : vector<1x384x256xbf16> to vector<384x256xbf16>
    %cst = arith.constant dense<0.000000e+00> : vector<160x256xf32>
    %4 = tpu.matmul %1, %3, %cst {dimension_numbers = #tpu.dot_dimension_numbers<[1], [0], [0], [1], [0, 0, 1, 1], [], []>} : vector<160x384xbf16>, vector<384x256xbf16>, vector<160x256xf32> -> vector<160x256xf32>
    %c0_5 = arith.constant 0 : index
    %c16 = arith.constant 16 : index
    %c0_6 = arith.constant 0 : index
    %5 = vector.load %arg1[%c0_5, %c16, %c0_6] : memref<1x176x384xbf16, #tpu.memory_space<vmem>>, vector<1x160x384xbf16>
    %6 = vector.shape_cast %5 : vector<1x160x384xbf16> to vector<160x384xbf16>
    %c1 = arith.constant 1 : index
    %c0_7 = arith.constant 0 : index
    %c0_8 = arith.constant 0 : index
    %7 = vector.load %arg2[%c1, %c0_7, %c0_8] : memref<2x384x256xbf16, #tpu.memory_space<vmem>>, vector<1x384x256xbf16>
    %8 = vector.shape_cast %7 : vector<1x384x256xbf16> to vector<384x256xbf16>
    %cst_9 = arith.constant dense<0.000000e+00> : vector<160x256xf32>
    %9 = tpu.matmul %6, %8, %cst_9 {dimension_numbers = #tpu.dot_dimension_numbers<[1], [0], [0], [1], [0, 0, 1, 1], [], []>} : vector<160x384xbf16>, vector<384x256xbf16>, vector<160x256xf32> -> vector<160x256xf32>
    %10 = arith.addf %4, %9 : vector<160x256xf32>
    %c0_10 = arith.constant 0 : index
    %c0_11 = arith.constant 0 : index
    %11 = vector.load %arg5[%c0_10, %c0_11] : memref<1x256xf32, #tpu.memory_space<vmem>>, vector<1x256xf32>
    %12 = vector.broadcast %11 : vector<1x256xf32> to vector<160x256xf32>
    %13 = arith.addf %10, %12 : vector<160x256xf32>
    %cst_12 = arith.constant 0.000000e+00 : f32
    %14 = vector.broadcast %cst_12 : f32 to vector<160x256xf32>
    %15 = arith.maximumf %13, %14 : vector<160x256xf32>
    %16 = arith.truncf %15 : vector<160x256xf32> to vector<160x256xbf16>
    %c0_13 = arith.constant 0 : index
    %c0_14 = arith.constant 0 : index
    %17 = vector.load %arg8[%c0_13, %c0_14] : memref<160x256xbf16, #tpu.memory_space<vmem>>, vector<160x256xbf16>
    tpu.vector_store %arg8[%c0_13, %c0_14], %16 {strides = array<i32>} : memref<160x256xbf16, #tpu.memory_space<vmem>>, vector<160x256xbf16>,
    %c0_15 = arith.constant 0 : index
    %c0_16 = arith.constant 0 : index
    %18 = vector.load %arg8[%c0_15, %c0_16] : memref<160x256xbf16, #tpu.memory_space<vmem>>, vector<128x256xbf16>
    %c0_17 = arith.constant 0 : index
    %c0_18 = arith.constant 0 : index
    %c0_19 = arith.constant 0 : index
    %19 = vector.load %arg3[%c0_17, %c0_18, %c0_19] : memref<2x256x128xbf16, #tpu.memory_space<vmem>>, vector<1x256x128xbf16>
    %20 = vector.shape_cast %19 : vector<1x256x128xbf16> to vector<256x128xbf16>
    %cst_20 = arith.constant dense<0.000000e+00> : vector<128x128xf32>
    %21 = tpu.matmul %18, %20, %cst_20 {dimension_numbers = #tpu.dot_dimension_numbers<[1], [0], [0], [1], [0, 0, 1, 1], [], []>} : vector<128x256xbf16>, vector<256x128xbf16>, vector<128x128xf32> -> vector<128x128xf32>
    %c16_21 = arith.constant 16 : index
    %c0_22 = arith.constant 0 : index
    %22 = vector.load %arg8[%c16_21, %c0_22] : memref<160x256xbf16, #tpu.memory_space<vmem>>, vector<128x256xbf16>
    %c1_23 = arith.constant 1 : index
    %c0_24 = arith.constant 0 : index
    %c0_25 = arith.constant 0 : index
    %23 = vector.load %arg3[%c1_23, %c0_24, %c0_25] : memref<2x256x128xbf16, #tpu.memory_space<vmem>>, vector<1x256x128xbf16>
    %24 = vector.shape_cast %23 : vector<1x256x128xbf16> to vector<256x128xbf16>
    %cst_26 = arith.constant dense<0.000000e+00> : vector<128x128xf32>
    %25 = tpu.matmul %22, %24, %cst_26 {dimension_numbers = #tpu.dot_dimension_numbers<[1], [0], [0], [1], [0, 0, 1, 1], [], []>} : vector<128x256xbf16>, vector<256x128xbf16>, vector<128x128xf32> -> vector<128x128xf32>
    %26 = arith.addf %21, %25 : vector<128x128xf32>
    %c0_27 = arith.constant 0 : index
    %c16_28 = arith.constant 16 : index
    %c128 = arith.constant 128 : index
    %27 = vector.load %arg1[%c0_27, %c16_28, %c128] : memref<1x176x384xbf16, #tpu.memory_space<vmem>>, vector<1x128x128xbf16>
    %28 = vector.shape_cast %27 : vector<1x128x128xbf16> to vector<128x128xbf16>
    %c0_29 = arith.constant 0 : index
    %c0_30 = arith.constant 0 : index
    %29 = vector.load %arg4[%c0_29, %c0_30] : memref<128x128xbf16, #tpu.memory_space<vmem>>, vector<128x128xbf16>
    %cst_31 = arith.constant dense<0.000000e+00> : vector<128x128xf32>
    %30 = tpu.matmul %28, %29, %cst_31 {dimension_numbers = #tpu.dot_dimension_numbers<[1], [0], [0], [1], [0, 0, 1, 1], [], []>} : vector<128x128xbf16>, vector<128x128xbf16>, vector<128x128xf32> -> vector<128x128xf32>
    %31 = arith.addf %26, %30 : vector<128x128xf32>
    %c0_32 = arith.constant 0 : index
    %c0_33 = arith.constant 0 : index
    %32 = vector.load %arg6[%c0_32, %c0_33] : memref<1x128xf32, #tpu.memory_space<vmem>>, vector<1x128xf32>
    %33 = vector.broadcast %32 : vector<1x128xf32> to vector<128x128xf32>
    %34 = arith.addf %31, %33 : vector<128x128xf32>
    %cst_34 = arith.constant 0.000000e+00 : f32
    %35 = vector.broadcast %cst_34 : f32 to vector<128x128xf32>
    %36 = arith.maximumf %34, %35 : vector<128x128xf32>
    %37 = vector.extract_strided_slice %36 {offsets = [0, 0], sizes = [8, 128], strides = [1, 1]} : vector<128x128xf32> to vector<8x128xf32>
    %c0_35 = arith.constant 0 : index
    %c0_36 = arith.constant 0 : index
    %c0_37 = arith.constant 0 : index
    %38 = vector.load %arg7[%c0_35, %c0_36, %c0_37] : memref<1x64x128xf32, #tpu.memory_space<vmem>>, vector<1x8x128xf32>
    %39 = vector.shape_cast %38 : vector<1x8x128xf32> to vector<8x128xf32>
    %40 = vector.shape_cast %37 : vector<8x128xf32> to vector<1x8x128xf32>
    tpu.vector_store %arg7[%c0_35, %c0_36, %c0_37], %40 {strides = array<i32>} : memref<1x64x128xf32, #tpu.memory_space<vmem>>, vector<1x8x128xf32>,
    %41 = vector.extract_strided_slice %36 {offsets = [16, 0], sizes = [8, 128], strides = [1, 1]} : vector<128x128xf32> to vector<8x128xf32>
    %c0_38 = arith.constant 0 : index
    %c8 = arith.constant 8 : index
    %c0_39 = arith.constant 0 : index
    %42 = vector.load %arg7[%c0_38, %c8, %c0_39] : memref<1x64x128xf32, #tpu.memory_space<vmem>>, vector<1x8x128xf32>
    %43 = vector.shape_cast %42 : vector<1x8x128xf32> to vector<8x128xf32>
    %44 = vector.shape_cast %41 : vector<8x128xf32> to vector<1x8x128xf32>
    tpu.vector_store %arg7[%c0_38, %c8, %c0_39], %44 {strides = array<i32>} : memref<1x64x128xf32, #tpu.memory_space<vmem>>, vector<1x8x128xf32>,
    %45 = vector.extract_strided_slice %36 {offsets = [32, 0], sizes = [8, 128], strides = [1, 1]} : vector<128x128xf32> to vector<8x128xf32>
    %c0_40 = arith.constant 0 : index
    %c16_41 = arith.constant 16 : index
    %c0_42 = arith.constant 0 : index
    %46 = vector.load %arg7[%c0_40, %c16_41, %c0_42] : memref<1x64x128xf32, #tpu.memory_space<vmem>>, vector<1x8x128xf32>
    %47 = vector.shape_cast %46 : vector<1x8x128xf32> to vector<8x128xf32>
    %48 = vector.shape_cast %45 : vector<8x128xf32> to vector<1x8x128xf32>
    tpu.vector_store %arg7[%c0_40, %c16_41, %c0_42], %48 {strides = array<i32>} : memref<1x64x128xf32, #tpu.memory_space<vmem>>, vector<1x8x128xf32>,
    %49 = vector.extract_strided_slice %36 {offsets = [48, 0], sizes = [8, 128], strides = [1, 1]} : vector<128x128xf32> to vector<8x128xf32>
    %c0_43 = arith.constant 0 : index
    %c24 = arith.constant 24 : index
    %c0_44 = arith.constant 0 : index
    %50 = vector.load %arg7[%c0_43, %c24, %c0_44] : memref<1x64x128xf32, #tpu.memory_space<vmem>>, vector<1x8x128xf32>
    %51 = vector.shape_cast %50 : vector<1x8x128xf32> to vector<8x128xf32>
    %52 = vector.shape_cast %49 : vector<8x128xf32> to vector<1x8x128xf32>
    tpu.vector_store %arg7[%c0_43, %c24, %c0_44], %52 {strides = array<i32>} : memref<1x64x128xf32, #tpu.memory_space<vmem>>, vector<1x8x128xf32>,
    %53 = vector.extract_strided_slice %36 {offsets = [64, 0], sizes = [8, 128], strides = [1, 1]} : vector<128x128xf32> to vector<8x128xf32>
    %c0_45 = arith.constant 0 : index
    %c32 = arith.constant 32 : index
    %c0_46 = arith.constant 0 : index
    %54 = vector.load %arg7[%c0_45, %c32, %c0_46] : memref<1x64x128xf32, #tpu.memory_space<vmem>>, vector<1x8x128xf32>
    %55 = vector.shape_cast %54 : vector<1x8x128xf32> to vector<8x128xf32>
    %56 = vector.shape_cast %53 : vector<8x128xf32> to vector<1x8x128xf32>
    tpu.vector_store %arg7[%c0_45, %c32, %c0_46], %56 {strides = array<i32>} : memref<1x64x128xf32, #tpu.memory_space<vmem>>, vector<1x8x128xf32>,
    %57 = vector.extract_strided_slice %36 {offsets = [80, 0], sizes = [8, 128], strides = [1, 1]} : vector<128x128xf32> to vector<8x128xf32>
    %c0_47 = arith.constant 0 : index
    %c40 = arith.constant 40 : index
    %c0_48 = arith.constant 0 : index
    %58 = vector.load %arg7[%c0_47, %c40, %c0_48] : memref<1x64x128xf32, #tpu.memory_space<vmem>>, vector<1x8x128xf32>
    %59 = vector.shape_cast %58 : vector<1x8x128xf32> to vector<8x128xf32>
    %60 = vector.shape_cast %57 : vector<8x128xf32> to vector<1x8x128xf32>
    tpu.vector_store %arg7[%c0_47, %c40, %c0_48], %60 {strides = array<i32>} : memref<1x64x128xf32, #tpu.memory_space<vmem>>, vector<1x8x128xf32>,
    %61 = vector.extract_strided_slice %36 {offsets = [96, 0], sizes = [8, 128], strides = [1, 1]} : vector<128x128xf32> to vector<8x128xf32>
    %c0_49 = arith.constant 0 : index
    %c48 = arith.constant 48 : index
    %c0_50 = arith.constant 0 : index
    %62 = vector.load %arg7[%c0_49, %c48, %c0_50] : memref<1x64x128xf32, #tpu.memory_space<vmem>>, vector<1x8x128xf32>
    %63 = vector.shape_cast %62 : vector<1x8x128xf32> to vector<8x128xf32>
    %64 = vector.shape_cast %61 : vector<8x128xf32> to vector<1x8x128xf32>
    tpu.vector_store %arg7[%c0_49, %c48, %c0_50], %64 {strides = array<i32>} : memref<1x64x128xf32, #tpu.memory_space<vmem>>, vector<1x8x128xf32>,
    %65 = vector.extract_strided_slice %36 {offsets = [112, 0], sizes = [8, 128], strides = [1, 1]} : vector<128x128xf32> to vector<8x128xf32>
    %c0_51 = arith.constant 0 : index
    %c56 = arith.constant 56 : index
    %c0_52 = arith.constant 0 : index
    %66 = vector.load %arg7[%c0_51, %c56, %c0_52] : memref<1x64x128xf32, #tpu.memory_space<vmem>>, vector<1x8x128xf32>
    %67 = vector.shape_cast %66 : vector<1x8x128xf32> to vector<8x128xf32>
    %68 = vector.shape_cast %65 : vector<8x128xf32> to vector<1x8x128xf32>
    tpu.vector_store %arg7[%c0_51, %c56, %c0_52], %68 {strides = array<i32>} : memref<1x64x128xf32, #tpu.memory_space<vmem>>, vector<1x8x128xf32>,
    return
  }
  func.func @transform_0(%arg0: i32) -> (i32, i32, i32) {
    %c0_i32 = arith.constant 0 : i32
    %c0_i32_0 = arith.constant 0 : i32
    %c0_i32_1 = arith.constant 0 : i32
    return %arg0, %c0_i32, %c0_i32_0 : i32, i32, i32
  }
  func.func @transform_1(%arg0: i32) -> (i32, i32, i32) {
    %c0_i32 = arith.constant 0 : i32
    %c0_i32_0 = arith.constant 0 : i32
    %c0_i32_1 = arith.constant 0 : i32
    %c0_i32_2 = arith.constant 0 : i32
    return %c0_i32, %c0_i32_0, %c0_i32_1 : i32, i32, i32
  }
  func.func @transform_2(%arg0: i32) -> (i32, i32, i32) {
    %c0_i32 = arith.constant 0 : i32
    %c0_i32_0 = arith.constant 0 : i32
    %c0_i32_1 = arith.constant 0 : i32
    %c0_i32_2 = arith.constant 0 : i32
    return %c0_i32, %c0_i32_0, %c0_i32_1 : i32, i32, i32
  }
  func.func @transform_3(%arg0: i32) -> (i32, i32) {
    %c0_i32 = arith.constant 0 : i32
    %c0_i32_0 = arith.constant 0 : i32
    %c0_i32_1 = arith.constant 0 : i32
    return %c0_i32, %c0_i32_0 : i32, i32
  }
  func.func @transform_4(%arg0: i32) -> (i32, i32) {
    %c0_i32 = arith.constant 0 : i32
    %c0_i32_0 = arith.constant 0 : i32
    %c0_i32_1 = arith.constant 0 : i32
    return %c0_i32, %c0_i32_0 : i32, i32
  }
  func.func @transform_5(%arg0: i32) -> (i32, i32) {
    %c0_i32 = arith.constant 0 : i32
    %c0_i32_0 = arith.constant 0 : i32
    %c0_i32_1 = arith.constant 0 : i32
    return %c0_i32, %c0_i32_0 : i32, i32
  }
  func.func @transform_6(%arg0: i32) -> (i32, i32, i32) {
    %c0_i32 = arith.constant 0 : i32
    %c0_i32_0 = arith.constant 0 : i32
    %c0_i32_1 = arith.constant 0 : i32
    return %arg0, %c0_i32, %c0_i32_0 : i32, i32, i32
  }
}

</mosaic_0001>

<bundles_post_ra>
// kernel: tpu_custom_call.1
= control target key start
LH: loop header
LB: loop body
LE: loop exit
PB: predicated region body
PF: predicated region fallthrough
CT: control target
= control target key end

     0   :  { %s5363_s0 = inlined_call_operand.hbm [shape: bf16[2,176,384], index: 0, kind: input, shape index: {}]   ;;  %s5364_s1 = inlined_call_operand.hbm [shape: bf16[2,384,256], index: 1, kind: input, shape index: {}]   ;;  %s5365_s2 = inlined_call_operand.hbm [shape: bf16[2,256,128], index: 2, kind: input, shape index: {}]   ;;  %s5366_s3 = inlined_call_operand.hbm [shape: bf16[128,128], index: 3, kind: input, shape index: {}]   ;;  %s5367_s4 = inlined_call_operand.vmem [shape: f32[1,256], index: 4, kind: input, shape index: {}]   ;;  %s5368_s5 = inlined_call_operand.vmem [shape: f32[1,128], index: 5, kind: input, shape index: {}]   ;;  %s5369_s6 = inlined_call_operand.hbm [shape: f32[2,64,128], index: 6, kind: output, shape index: {}]  }
   0x1   :  { %5377 = sst [smem:[#allocation32_spill]] %s5364_s1 }
   0x2   :  { %5378 = sst [smem:[#allocation33_spill]] %s5365_s2 }
   0x3   :  { %11 = vsyncpa [#allocation4], 0 }
   0x4   :  { %13 = vsyncpa [#allocation4 + $0x1], 0 }
   0x5   :  { %14 = vsyncpa [#allocation7], 0 }
   0x6   :  { %15 = vsyncpa [#allocation10], 0 }
   0x7   :  { %16 = vsyncpa [#allocation5], 0 }
   0x8   :  { %18 = vsyncpa [#allocation5 + $0x1], 0  ;;  %s4468_s21 = smov 0   ;;  %s4470_s22 = smov 0  }
   0x9   :  { %s4472_s23 = smov 0   ;;  %s4474_s24 = smov 0  }
   0xa LB: > { %s4489_s25 = sadd.s32 4294967295, %s4420_s24   ;;  %s2985_s26 = sadd.s32 4294967294, %s4420_s24   ;;  %s4420_s24 = sphi %s4474_s24, %s5423_s24   ;;  %s4416_s23 = sphi %s4472_s23, %s5422_s23   ;;  %s4412_s22 = sphi %s4470_s22, %s5421_s22   ;;  %s4408_s21 = sphi %s4468_s21, %s5420_s21  }
   0xb   : > { %p44_p0 = scmp.ne.s32.totalorder %s4412_s22, %s4408_s21  ;;  %p45_p1 = scmp.eq.s32.totalorder %s4489_s25, 0 }
   0xc   : > { %p173_p2 = scmp.eq.s32.totalorder %s4489_s25, 1  ;;  %p179_p3 = scmp.eq.s32.totalorder %s2985_s26, 1 }
   0xd   : > { %p4498_p4 = por %p45_p1, %p44_p0  ;;  %p2986_p5 = scmp.ge.s32.totalorder %s4420_s24, 1 }
   0xe   : > { %p4503_p6 = por %p179_p3, %p44_p0  ;;  %p186_p7 = scmp.lt.s32.totalorder %s4420_s24, 3 }
   0xf   : > { %s5381_s1 = sld [smem:[#allocation32_spill]]  ;;  %s4422_s9 = smov [#allocation6]  }
  0x10   : > { %p4511_p8 = pnand %p2986_p5, %p186_p7  ;;  %s199_s10 = sshll.u32 %s4422_s9, 4  ;;  %s200_s10 = int_to_ptr.vmem [resolvable:$true] %s199_s10 }
  0x11   : > { %s5384_s2 = sld [smem:[#allocation33_spill]]  ;;  %s4423_s15 = smov 128  }
  0x12   : > { %p4156_p9 = pneg %p4511_p8  ;;  %s4424_s16 = smov 8  }
  0x13   : > { %s4425_s17 = smov [#allocation8]   ;;  %s4426_s19 = smov 64  }
  0x14   : > { %p4519_p10 = pnand %p4156_p9, %p45_p1  ;;  %s213_s18 = sshll.u32 %s4425_s17, 4  ;;  %s214_s18 = int_to_ptr.vmem [resolvable:$true] %s213_s18 }
  0x15   : > { %s197_s7 = sshll.u32 %s5381_s1, 4  ;;  %s4427_s20 = smov 4   ;;  %s198_s7 = int_to_ptr.hbm [resolvable:$true] %s197_s7 }
  0x16   : > { %4159 = dma.hbm_to_vmem [thread:$0]  (!%p4519_p10), %s198_s7, 12288, %s200_s10, [#allocation7], %s4423_s15, %s4423_s15, %s4424_s16  }
  0x17   : > { %s211_s14 = sshll.u32 %s5384_s2, 4  ;;  %s225_s30 = sshll.u32 %s5366_s3, 4  ;;  %s212_s14 = int_to_ptr.hbm [resolvable:$true] %s211_s14  ;;  %s226_s30 = int_to_ptr.hbm [resolvable:$true] %s225_s30 }
  0x18   : > { %4162 = dma.hbm_to_vmem [thread:$0]  (!%p4519_p10), %s212_s14, 4096, %s214_s18, [#allocation7], %s4426_s19, %s4426_s19, %s4427_s20  }
  0x19   : > { %s4428_s7 = smov [#allocation9]   ;;  %s4537_s10 = sadd.s32 1, %s4420_s24  }
  0x1a   : > { %s227_s9 = sshll.u32 %s4428_s7, 4  ;;  %s28_s12 = ssub.s32 %s4420_s24, %s4537_s10  ;;  %s228_s9 = int_to_ptr.vmem [resolvable:$true] %s227_s9 }
  0x1b   : > { %4165 = dma.hbm_to_vmem [thread:$0]  (!%p4519_p10), %s226_s30, 1024, %s228_s9, [#allocation10], %s4426_s19, %s4426_s19, %s4427_s20  }
  0x1c   : > { %s31_s13 = sadd.s32 1, %s4416_s23  ;;  %p29_p12 = scmp.eq.s32.totalorder %s28_s12, 0 }
  0x1d   : > { %p38_p13 = scmp.ne.s32.totalorder %s4416_s23, %s4412_s22  ;;  %p39_p0 = scmp.eq.s32.totalorder %s4420_s24, 0 }
  0x1e   : > { %p4177_p3 = scmp.lt.s32.totalorder %s4420_s24, 2  ;;  %s247_s16 = sand.u32 1, %s4416_s23  }
  0x1f   : > { %s4547_s14 = scalar_select %p29_p12, %s4416_s23, %s31_s13  }
  0x20   : > { %p40_p5 = por %p39_p0, %p38_p13  ;;  %p4551_p7 = por %p173_p2, %p38_p13 }
  0x21   : > { %s4138_s11 = smul.u32 264, %s4420_s24  ;;  %s248_s9 = scalar_lea.sflag [#allocation4], %s247_s16 }
  0x22   : > { %s4137_s17 = smul.u32 264, %s247_s16  ;;  %p4560_p9 = pnand %p4177_p3, %p40_p5 }
  0x23   : > { %s256_s20 = scalar_lea.hbm %s5363_s0, %s4138_s11  ;;  %s4323_s19 = scalar_lea.hbm %s5363_s0, 528 }
  0x24   : > { %s257_s29 = sshll.u32 %s256_s20, 4  ;;  %s251_s30 = scalar_lea.vmem [#allocation3], %s4137_s17  ;;  %s258_s29 = int_to_ptr.hbm [resolvable:$true] %s257_s29 }
  0x25   : > { %s259_s7 = sshll.u32 %s251_s30, 4  ;;  %s4316_s12 = sshra.s32 %s258_s29, 4  ;;  %s260_s7 = int_to_ptr.vmem [resolvable:$true] %s259_s7  ;;  %s4317_s12 = int_to_ptr.hbm [resolvable:$true] %s4316_s12 }
  0x26   : > { %s4318_s13 = scalar_lea.hbm %s4317_s12, 264  ;;  %p4320_p10 = pneg %p4560_p9 }
  0x27   : > { %p4319_p2 = scmp.ne.s32.totalorder %s4317_s12, %s4318_s13  ;;  %p4324_p0 = scmp.lt.s32.totalorder %s4317_s12, %s5363_s0 }
  0x28   : > { %p4325_p3 = scmp.lt.s32.totalorder %s4323_s19, %s4318_s13 }
  0x29   : > { %p4321_p12 = pnand %p4320_p10, %p4319_p2 }
  0x2a   : > { %p4326_p5 = por %p4325_p3, %p4324_p0 }
  0x2b   : > { %p4322_p13 = pneg %p4321_p12 }
  0x2d   : > { %p4327_p11 = pnand %p4326_p5, %p4322_p13 }
  0x2f   : > { %4330 = shalt.err (!%p4327_p11)
}
  0x30   : > { %s4429_s16 = smov 192   ;;  %s4430_s17 = smov 12  }
  0x31   : > { %4169 = dma.hbm_to_vmem [thread:$0]  (!%p4560_p9), %s258_s29, 4224, %s260_s7, %s248_s9, %s4429_s16, %s4429_s16, %s4430_s17  }
  0x32   : > { %271 = sbr.rel (%p4511_p8) target bundleno = 1004 (0x3ec), region = 44 }
  0x37   : > { %s4577_s20 = sand.u32 1, %s4412_s22  }
  0x38   : > { %s4139_s1 = smul.u32 264, %s4577_s20  ;;  %s274_s2 = scalar_lea.sflag [#allocation4], %s4577_s20 }
  0x3a   : > { %s4581_s30 = scalar_lea.vmem [#allocation3], %s4139_s1 }
  0x3b   : > { %4391 = dma.done.wait (%p4498_p4), %s274_s2, 4224  }
  0x3c   : > { %4393 = vsyncadd (%p4498_p4), %s274_s2, 4294963072 }
  0x3d   : > { %4395 = dma.done.wait (%p45_p1), [#allocation7], 16384  }
  0x3e   : > { %4397 = vsyncadd (%p45_p1), [#allocation7], 4294950912 }
  0x3f   : > { %4399 = dma.done.wait (%p45_p1), [#allocation10], 1024  }
  0x40   : > { %4401 = vsyncadd (%p45_p1), [#allocation10], 4294966272  ;;  %v3175_v0 = vld [vmem:[#allocation6 + $0x1f0] sm:$0xf]  ;;  %v4013_v1 = vld [vmem:[#allocation6 + $0x1f4] sm:$0xf0] }
  0x41   : > { %v3167_v2 = vld [vmem:[#allocation6 + $0x1e0] sm:$0xf]  ;;  %v3176_v3 = vor.u32 %v4013_v1, %v3175_v0  ;;  %v4011_v4 = vld [vmem:[#allocation6 + $0x1e4] sm:$0xf0]  ;;  %v3159_v6 = vld [vmem:[#allocation6 + $0x1d0] sm:$0xf] }
  0x42   : > { %v3168_v5 = vor.u32 %v4011_v4, %v3167_v2  ;;  %v4009_v7 = vld [vmem:[#allocation6 + $0x1d4] sm:$0xf0]  ;;  %v3151_v9 = vld [vmem:[#allocation6 + $0x1c0] sm:$0xf]  ;;  %v4007_v10 = vld [vmem:[#allocation6 + $0x1c4] sm:$0xf0] }
  0x43   : > { %899 = vmatpush.bf16.msra.mxu0 %v3176_v3  ;;  %4113 = vmatpush.bf16.msra.mxu1 %v3176_v3  ;;  %v3160_v8 = vor.u32 %v4009_v7, %v3159_v6  ;;  %v3152_v11 = vor.u32 %v4007_v10, %v3151_v9  ;;  %v3143_v12 = vld [vmem:[#allocation6 + $0x1b0] sm:$0xf]  ;;  %v4005_v13 = vld [vmem:[#allocation6 + $0x1b4] sm:$0xf0]  ;;  %v3135_v15 = vld [vmem:[#allocation6 + $0x1a0] sm:$0xf] }
  0x44   : > { %4114 = vmatpush.bf16.msra.mxu2 %v3176_v3  ;;  %4115 = vmatpush.bf16.msra.mxu3 %v3176_v3  ;;  %v3144_v14 = vor.u32 %v4005_v13, %v3143_v12  ;;  %v4003_v16 = vld [vmem:[#allocation6 + $0x1a4] sm:$0xf0]  ;;  %v3127_v18 = vld [vmem:[#allocation6 + $0x190] sm:$0xf]  ;;  %v4001_v19 = vld [vmem:[#allocation6 + $0x194] sm:$0xf0] }
  0x45   : > { %v3136_v17 = vor.u32 %v4003_v16, %v3135_v15  ;;  %v3128_v20 = vor.u32 %v4001_v19, %v3127_v18  ;;  %v3119_v21 = vld [vmem:[#allocation6 + $0x180] sm:$0xf]  ;;  %v3999_v22 = vld [vmem:[#allocation6 + $0x184] sm:$0xf0]  ;;  %v3969_v24 = vld [vmem:[%s4581_s30 + $0x20] sm:$0xf0] }
  0x46   : > { %v2999_v23 = vld [vmem:[%s4581_s30 + $0x18] sm:$0xf]  ;;  %v4045_v26 = vld [vmem:[#allocation6 + $0x2f4] sm:$0xf0]  ;;  %v3120_v29 = vor.u32 %v3999_v22, %v3119_v21  ;;  %v3981_v31 = vld [vmem:[%s4581_s30 + $0x80] sm:$0xf0] }
  0x47   : > { %900 = vmatpush.bf16.msra.mxu0 %v3168_v5  ;;  %4116 = vmatpush.bf16.msra.mxu1 %v3168_v5  ;;  %v3303_v25 = vld [vmem:[#allocation6 + $0x2f0] sm:$0xf]  ;;  %v4029_v28 = vld [vmem:[#allocation6 + $0x274] sm:$0xf0]  ;;  %v3987_v33 = vld [vmem:[%s4581_s30 + $0xb0] sm:$0xf0]  ;;  %v4603_v41 = vor.u32 %v3969_v24, %v2999_v23 }
  0x48   : > { %4117 = vmatpush.bf16.msra.mxu2 %v3168_v5  ;;  %4118 = vmatpush.bf16.msra.mxu3 %v3168_v5  ;;  %v3239_v27 = vld [vmem:[#allocation6 + $0x270] sm:$0xf]  ;;  %v3071_v32 = vld [vmem:[%s4581_s30 + $0xa8] sm:$0xf]  ;;  %v3993_v35 = vld [vmem:[%s4581_s30 + $0xe0] sm:$0xf0]  ;;  %v3304_v36 = vor.u32 %v4045_v26, %v3303_v25 }
  0x49   : > { %v3047_v30 = vld [vmem:[%s4581_s30 + $0x78] sm:$0xf]  ;;  %v3240_v37 = vor.u32 %v4029_v28, %v3239_v27  ;;  %v4012_v38 = vld [vmem:[#allocation6 + $0x1f4] sm:$0xf]  ;;  %v3177_v39 = vld [vmem:[#allocation6 + $0x1f8] sm:$0xf0]  ;;  %v4607_v46 = vor.u32 %v3987_v33, %v3071_v32 }
  0x4a   : > { %v3095_v34 = vld [vmem:[%s4581_s30 + $0xd8] sm:$0xf]  ;;  %v3295_v40 = vld [vmem:[#allocation6 + $0x2e0] sm:$0xf]  ;;  %v4605_v42 = vor.u32 %v3981_v31, %v3047_v30  ;;  %v3180_v48 = vor.u32 %v4012_v38, %v3177_v39  ;;  %v4010_v49 = vld [vmem:[#allocation6 + $0x1e4] sm:$0xf] }
  0x4b   : > { %901 = vmatpush.bf16.msra.mxu0 %v3160_v8  ;;  %4119 = vmatpush.bf16.msra.mxu1 %v3160_v8  ;;  %v4043_v43 = vld [vmem:[#allocation6 + $0x2e4] sm:$0xf0]  ;;  %v3231_v44 = vld [vmem:[#allocation6 + $0x260] sm:$0xf]  ;;  %v4609_v47 = vor.u32 %v3993_v35, %v3095_v34  ;;  %v3169_v50 = vld [vmem:[#allocation6 + $0x1e8] sm:$0xf0] }
  0x4c   : > { %4120 = vmatpush.bf16.msra.mxu2 %v3160_v8  ;;  %4121 = vmatpush.bf16.msra.mxu3 %v3160_v8  ;;  %v4027_v45 = vld [vmem:[#allocation6 + $0x264] sm:$0xf0]  ;;  %v3296_v51 = vor.u32 %v4043_v43, %v3295_v40  ;;  %v3287_v53 = vld [vmem:[#allocation6 + $0x2d0] sm:$0xf]  ;;  %v4041_v54 = vld [vmem:[#allocation6 + $0x2d4] sm:$0xf0]  ;;  %v3172_v60 = vor.u32 %v4010_v49, %v3169_v50 }
  0x4d   : > { %v3232_v52 = vor.u32 %v4027_v45, %v3231_v44  ;;  %v3223_v55 = vld [vmem:[#allocation6 + $0x250] sm:$0xf]  ;;  %v4025_v56 = vld [vmem:[#allocation6 + $0x254] sm:$0xf0]  ;;  %v4028_v57 = vld [vmem:[#allocation6 + $0x274] sm:$0xf]  ;;  %v3288_v63 = vor.u32 %v4041_v54, %v3287_v53 }
  0x4e   : > { %v3241_v58 = vld [vmem:[#allocation6 + $0x278] sm:$0xf0]  ;;  %v4008_v61 = vld [vmem:[#allocation6 + $0x1d4] sm:$0xf]  ;;  %v3224_v0 = vor.u32 %v4025_v56, %v3223_v55  ;;  %v3279_v1 = vld [vmem:[#allocation6 + $0x2c0] sm:$0xf] }
  0x4f   : > { %902 = vmatpush.bf16.msra.mxu0 %v3152_v11  ;;  %4122 = vmatpush.bf16.msra.mxu1 %v3152_v11  ;;  %v3244_v59 = vor.u32 %v4028_v57, %v3241_v58  ;;  %v3161_v62 = vld [vmem:[#allocation6 + $0x1d8] sm:$0xf0]  ;;  %v4026_v2 = vld [vmem:[#allocation6 + $0x264] sm:$0xf]  ;;  %v3233_v3 = vld [vmem:[#allocation6 + $0x268] sm:$0xf0] }
  0x50   : > { %4123 = vmatpush.bf16.msra.mxu2 %v3152_v11  ;;  %4124 = vmatpush.bf16.msra.mxu3 %v3152_v11  ;;  %v4039_v4 = vld [vmem:[#allocation6 + $0x2c4] sm:$0xf0]  ;;  %v3215_v5 = vld [vmem:[#allocation6 + $0x240] sm:$0xf]  ;;  %v3236_v7 = vor.u32 %v4026_v2, %v3233_v3  ;;  %v4024_v8 = vld [vmem:[#allocation6 + $0x254] sm:$0xf]  ;;  %v3164_v10 = vor.u32 %v4008_v61, %v3161_v62 }
  0x51   : > { %v4023_v6 = vld [vmem:[#allocation6 + $0x244] sm:$0xf0]  ;;  %v3225_v9 = vld [vmem:[#allocation6 + $0x258] sm:$0xf0]  ;;  %v4006_v11 = vld [vmem:[#allocation6 + $0x1c4] sm:$0xf]  ;;  %v3280_v13 = vor.u32 %v4039_v4, %v3279_v1 }
  0x52   : > { %v3153_v12 = vld [vmem:[#allocation6 + $0x1c8] sm:$0xf0]  ;;  %v3011_v15 = vld [vmem:[%s4581_s30 + $0x30] sm:$0xf]  ;;  %v3271_v19 = vld [vmem:[#allocation6 + $0x2b0] sm:$0xf]  ;;  %v3228_v23 = vor.u32 %v4024_v8, %v3225_v9 }
  0x53   : > { %903 = vmatpush.bf16.msra.mxu0 %v3144_v14  ;;  %4125 = vmatpush.bf16.msra.mxu1 %v3144_v14  ;;  %v3972_v16 = vld [vmem:[%s4581_s30 + $0x38] sm:$0xf0]  ;;  %v3207_v21 = vld [vmem:[#allocation6 + $0x230] sm:$0xf]  ;;  %v4021_v22 = vld [vmem:[#allocation6 + $0x234] sm:$0xf0]  ;;  %v3156_v27 = vor.u32 %v4006_v11, %v3153_v12 }
  0x54   : > { %4126 = vmatpush.bf16.msra.mxu2 %v3144_v14  ;;  %4127 = vmatpush.bf16.msra.mxu3 %v3144_v14  ;;  %v3216_v14 = vor.u32 %v4023_v6, %v3215_v5  ;;  %v3984_v18 = vld [vmem:[%s4581_s30 + $0x98] sm:$0xf0]  ;;  %v3083_v24 = vld [vmem:[%s4581_s30 + $0xc0] sm:$0xf]  ;;  %v3990_v25 = vld [vmem:[%s4581_s30 + $0xc8] sm:$0xf0]  ;;  %v3208_v32 = vor.u32 %v4021_v22, %v3207_v21 }
  0x55   : > { %v3107_v26 = vld [vmem:[%s4581_s30 + $0xf0] sm:$0xf]  ;;  %v3996_v28 = vld [vmem:[%s4581_s30 + $0xf8] sm:$0xf0]  ;;  %v3145_v30 = vld [vmem:[#allocation6 + $0x1b8] sm:$0xf0]  ;;  %v4627_v43 = vor.u32 %v3990_v25, %v3083_v24 }
  0x56   : > { %v3263_v33 = vld [vmem:[#allocation6 + $0x2a0] sm:$0xf]  ;;  %v4022_v34 = vld [vmem:[#allocation6 + $0x244] sm:$0xf]  ;;  %v3217_v35 = vld [vmem:[#allocation6 + $0x248] sm:$0xf0]  ;;  %v4629_v44 = vor.u32 %v3996_v28, %v3107_v26 }
  0x57   : > { %904 = vmatpush.bf16.msra.mxu0 %v3136_v17  ;;  %4128 = vmatpush.bf16.msra.mxu1 %v3136_v17  ;;  %v4035_v38 = vld [vmem:[#allocation6 + $0x2a4] sm:$0xf0]  ;;  %v3199_v39 = vld [vmem:[#allocation6 + $0x220] sm:$0xf]  ;;  %v3137_v49 = vld [vmem:[#allocation6 + $0x1a8] sm:$0xf0]  ;;  %v3220_v50 = vor.u32 %v4022_v34, %v3217_v35 }
  0x58   : > { %4129 = vmatpush.bf16.msra.mxu2 %v3136_v17  ;;  %4130 = vmatpush.bf16.msra.mxu3 %v3136_v17  ;;  %v3059_v17 = vld [vmem:[%s4581_s30 + $0x90] sm:$0xf]  ;;  %v3255_v53 = vld [vmem:[#allocation6 + $0x290] sm:$0xf]  ;;  %v4020_v54 = vld [vmem:[#allocation6 + $0x234] sm:$0xf] }
  0x59   : > { %v4019_v40 = vld [vmem:[#allocation6 + $0x224] sm:$0xf0]  ;;  %v3209_v55 = vld [vmem:[#allocation6 + $0x238] sm:$0xf0]  ;;  %v4033_v56 = vld [vmem:[#allocation6 + $0x294] sm:$0xf0] }
  0x5a   : > { %v3191_v57 = vld [vmem:[#allocation6 + $0x210] sm:$0xf]  ;;  %v4017_v58 = vld [vmem:[#allocation6 + $0x214] sm:$0xf0]  ;;  %v3129_v61 = vld [vmem:[#allocation6 + $0x198] sm:$0xf0] }
  0x5b   : > { %905 = vmatpush.bf16.msra.mxu0 %v3128_v20  ;;  %4131 = vmatpush.bf16.msra.mxu1 %v3128_v20  ;;  %v3247_v62 = vld [vmem:[#allocation6 + $0x280] sm:$0xf]  ;;  %v3192_v1 = vor.u32 %v4017_v58, %v3191_v57  ;;  %v4031_v2 = vld [vmem:[#allocation6 + $0x284] sm:$0xf0]  ;;  %v4018_v3 = vld [vmem:[#allocation6 + $0x224] sm:$0xf] }
  0x5c   : > { %4132 = vmatpush.bf16.msra.mxu2 %v3128_v20  ;;  %4133 = vmatpush.bf16.msra.mxu3 %v3128_v20  ;;  %v4037_v20 = vld [vmem:[#allocation6 + $0x2b4] sm:$0xf0]  ;;  %v3201_v4 = vld [vmem:[#allocation6 + $0x228] sm:$0xf0]  ;;  %v3183_v5 = vld [vmem:[#allocation6 + $0x200] sm:$0xf] }
  0x5d   : > { %v3272_v31 = vor.u32 %v4037_v20, %v3271_v19  ;;  %v4015_v6 = vld [vmem:[#allocation6 + $0x204] sm:$0xf0]  ;;  %v3935_v8 = vld [vmem:[#allocation6 + $0x74] sm:$0xf0]  ;;  %v4044_v9 = vld [vmem:[#allocation6 + $0x2f4] sm:$0xf] }
  0x5e   : > { %v3998_v12 = vld [vmem:[#allocation6 + $0x184] sm:$0xf]  ;;  %v3193_v19 = vld [vmem:[#allocation6 + $0x218] sm:$0xf0]  ;;  %v3551_v22 = vld [vmem:[#allocation6 + $0xf0] sm:$0xf] }
  0x5f   : > { %906 = vmatpush.bf16.msra.mxu0 %v3120_v29  ;;  %4134 = vmatpush.bf16.msra.mxu1 %v3120_v29  ;;  %v3975_v20 = vld [vmem:[%s4581_s30 + $0x50] sm:$0xf0]  ;;  %v3968_v25 = vld [vmem:[%s4581_s30 + $0x1c] sm:$0xf]  ;;  %v3001_v26 = vld [vmem:[%s4581_s30 + $0x24] sm:$0xf0] }
  0x60   : > { %4135 = vmatpush.bf16.msra.mxu2 %v3120_v29  ;;  %4136 = vmatpush.bf16.msra.mxu3 %v3120_v29  ;;  %v4004_v29 = vld [vmem:[#allocation6 + $0x1b4] sm:$0xf]  ;;  %v3543_v34 = vld [vmem:[#allocation6 + $0xe0] sm:$0xf]  ;;  %v4042_v35 = vld [vmem:[#allocation6 + $0x2e4] sm:$0xf] }
  0x61   : > { %v3148_v45 = vor.u32 %v4004_v29, %v3145_v30  ;;  %v3970_v29 = vld [vmem:[%s4581_s30 + $0x28] sm:$0xf0]  ;;  %v3479_v30 = vld [vmem:[#allocation6 + $0x60] sm:$0xf]  ;;  %v3535_v57 = vld [vmem:[#allocation6 + $0xd0] sm:$0xf] }
  0x62   : > { %907 = vmatmul.bf16.vlgmr.msra.gmra.mxu0 %v4603_v41  ;;  %927 = vmatmul.bf16.vlgmr.msra.gmra.mxu1 %v4605_v42  ;;  %s2996_s7 = sshll.u32 %s4577_s20, 6  ;;  %s4112_s12 = sshll.u32 %s4489_s25, 6 }
  0x63   : > { %958 = vmatpush.bf16.msrb.mxu1 %v3240_v37  ;;  %937 = vmatmul.bf16.vlgmr.msra.gmra.mxu2 %v4607_v46  ;;  %v4625_v37 = vor.u32 %v3984_v18, %v3059_v17  ;;  %v3023_v17 = vld [vmem:[%s4581_s30 + $0x48] sm:$0xf]  ;;  %v4016_v18 = vld [vmem:[#allocation6 + $0x214] sm:$0xf]  ;;  %s5314_s9 = scalar_lea.vmem [#allocation11], %s2996_s7  ;;  %s2879_s18 = scalar_lea.hbm %s5369_s6, %s4112_s12 }
  0x64   : > { %1017 = vmatpush.bf16.msrb.mxu2 %v3304_v36  ;;  %947 = vmatmul.bf16.vlgmr.msra.gmra.mxu3 %v4609_v47  ;;  %v4623_v36 = vor.u32 %v3972_v16, %v3011_v15  ;;  %v3248_v15 = vor.u32 %v4031_v2, %v3247_v62  ;;  %v3184_v16 = vor.u32 %v4015_v6, %v3183_v5  ;;  %v3013_v2 = vld [vmem:[%s4581_s30 + $0x3c] sm:$0xf0]  ;;  %s2880_s19 = sshll.u32 %s5314_s9, 4  ;;  %s2882_s16 = sshll.u32 %s2879_s18, 4  ;;  %s2881_s19 = int_to_ptr.vmem [resolvable:$true] %s2880_s19  ;;  %s2883_s16 = int_to_ptr.hbm [resolvable:$true] %s2882_s16 }
  0x65   : > { %1076 = vmatpush.bf16.msrb.mxu3 %v3180_v48  ;;  %1135 = vmatpush.bf16.msrb.mxu0 %v3244_v59  ;;  %v4002_v48 = vld [vmem:[#allocation6 + $0x1a4] sm:$0xf]  ;;  %s2868_s17 = scalar_lea.sflag [#allocation5], %s4577_s20  ;;  %s4360_s1 = sshra.s32 %s2883_s16, 4  ;;  %s4361_s1 = int_to_ptr.hbm [resolvable:$true] %s4360_s1 }
  0x66   : > { %v3140_v59 = vor.u32 %v4002_v48, %v3137_v49  ;;  %v4014_v48 = vld [vmem:[#allocation6 + $0x204] sm:$0xf]  ;;  %v3185_v49 = vld [vmem:[#allocation6 + $0x208] sm:$0xf0]  ;;  %s4362_s2 = scalar_lea.hbm %s4361_s1, 64  ;;  %s4366_s27 = scalar_lea.hbm %s5369_s6, 128 }
  0x67   : > { %959 = vmatpush.bf16.msrb.mxu1 %v3232_v52  ;;  %v3200_v52 = vor.u32 %v4019_v40, %v3199_v39  ;;  %v4641_v39 = vor.u32 %v3975_v20, %v3023_v17  ;;  %v3004_v40 = vor.u32 %v3968_v25, %v3001_v26  ;;  %v3976_v17 = vld [vmem:[%s4581_s30 + $0x58] sm:$0xf0]  ;;  %v3979_v25 = vld [vmem:[%s4581_s30 + $0x70] sm:$0xf0]  ;;  %p4363_p1 = scmp.ne.s32.totalorder %s4361_s1, %s4362_s2  ;;  %p4367_p11 = scmp.lt.s32.totalorder %s4361_s1, %s5369_s6 }
  0x68   : > { %1018 = vmatpush.bf16.msrb.mxu2 %v3296_v51  ;;  %v3264_v51 = vor.u32 %v4035_v38, %v3263_v33  ;;  %v3297_v38 = vld [vmem:[#allocation6 + $0x2e8] sm:$0xf0]  ;;  %p4368_p9 = scmp.lt.s32.totalorder %s4366_s27, %s4362_s2 }
  0x69   : > { %1077 = vmatpush.bf16.msrb.mxu3 %v3172_v60  ;;  %1136 = vmatpush.bf16.msrb.mxu0 %v3236_v7  ;;  %v4000_v60 = vld [vmem:[#allocation6 + $0x194] sm:$0xf]  ;;  %v3487_v7 = vld [vmem:[#allocation6 + $0x70] sm:$0xf]  ;;  %v3281_v20 = vld [vmem:[#allocation6 + $0x2c8] sm:$0xf0]  ;;  %p4364_p4 = pnand %p4363_p1, %p4551_p7 }
  0x6a   : > { %v3132_v11 = vor.u32 %v4000_v60, %v3129_v61  ;;  %v3488_v21 = vor.u32 %v3935_v8, %v3487_v7  ;;  %v4040_v60 = vld [vmem:[#allocation6 + $0x2d4] sm:$0xf]  ;;  %v3289_v61 = vld [vmem:[#allocation6 + $0x2d8] sm:$0xf0]  ;;  %v3463_v8 = vld [vmem:[#allocation6 + $0x40] sm:$0xf]  ;;  %p4369_p2 = por %p4368_p9, %p4367_p11 }
  0x6b   : > { %960 = vmatpush.bf16.msrb.mxu1 %v3224_v0  ;;  %v3256_v0 = vor.u32 %v4033_v56, %v3255_v53  ;;  %v3931_v56 = vld [vmem:[#allocation6 + $0x54] sm:$0xf0]  ;;  %p4365_p8 = pneg %p4364_p4 }
  0x6c   : > { %1019 = vmatpush.bf16.msrb.mxu2 %v3288_v63  ;;  %v3212_v63 = vor.u32 %v4020_v54, %v3209_v55  ;;  %v3188_v54 = vor.u32 %v4014_v48, %v3185_v49  ;;  %v3471_v55 = vld [vmem:[#allocation6 + $0x50] sm:$0xf]  ;;  %v3982_v48 = vld [vmem:[%s4581_s30 + $0x88] sm:$0xf0] }
  0x6d   : > { %1078 = vmatpush.bf16.msrb.mxu3 %v3164_v10  ;;  %1137 = vmatpush.bf16.msrb.mxu0 %v3228_v23  ;;  %v3305_v10 = vld [vmem:[#allocation6 + $0x2f8] sm:$0xf0]  ;;  %v3951_v23 = vld [vmem:[#allocation6 + $0xf4] sm:$0xf0]  ;;  %v3472_v58 = vor.u32 %v3931_v56, %v3471_v55  ;;  %v3511_v55 = vld [vmem:[#allocation6 + $0xa0] sm:$0xf]  ;;  %p4370_p10 = pnand %p4369_p2, %p4365_p8 }
  0x6e   : > { %v3308_v24 = vor.u32 %v4044_v9, %v3305_v10  ;;  %v3552_v33 = vor.u32 %v3951_v23, %v3551_v22  ;;  %v3929_v9 = vld [vmem:[#allocation6 + $0x44] sm:$0xf0]  ;;  %v3527_v10 = vld [vmem:[#allocation6 + $0xc0] sm:$0xf]  ;;  %v3977_v22 = vld [vmem:[%s4581_s30 + $0x64] sm:$0xf] }
  0x6f   : > { %961 = vmatpush.bf16.msrb.mxu1 %v3216_v14  ;;  %v3204_v14 = vor.u32 %v4018_v3, %v3201_v4  ;;  %v3019_v3 = vld [vmem:[%s4581_s30 + $0x38] sm:$0xf]  ;;  %v3973_v4 = vld [vmem:[%s4581_s30 + $0x40] sm:$0xf0]  ;;  %v3037_v23 = vld [vmem:[%s4581_s30 + $0x6c] sm:$0xf0] }
  0x70   : > { %1020 = vmatpush.bf16.msrb.mxu2 %v3280_v13  ;;  %v3121_v13 = vld [vmem:[#allocation6 + $0x188] sm:$0xf0]  ;;  %v4654_v7 = vor.u32 %v3973_v4, %v3019_v3  ;;  %v3040_v26 = vor.u32 %v3977_v22, %v3037_v23  ;;  %v3941_v56 = vld [vmem:[#allocation6 + $0xa4] sm:$0xf0]  ;;  %v3503_v3 = vld [vmem:[#allocation6 + $0x90] sm:$0xf] }
  0x71   : > { %1079 = vmatpush.bf16.msrb.mxu3 %v3156_v27  ;;  %1138 = vmatpush.bf16.msrb.mxu0 %v3220_v50  ;;  %v3007_v27 = vld [vmem:[%s4581_s30 + $0x20] sm:$0xf]  ;;  %v3124_v28 = vor.u32 %v3998_v12, %v3121_v13  ;;  %v3945_v12 = vld [vmem:[#allocation6 + $0xc4] sm:$0xf0]  ;;  %v3989_v22 = vld [vmem:[%s4581_s30 + $0xc4] sm:$0xf] }
  0x72   : > { %912 = vmatmul.bf16.gmra.mxu0 %v4623_v36  ;;  %932 = vmatmul.bf16.gmra.mxu1 %v4625_v37  ;;  %v4643_v50 = vor.u32 %v3970_v29, %v3007_v27  ;;  %v3528_v13 = vor.u32 %v3945_v12, %v3527_v10  ;;  %v3927_v29 = vld [vmem:[#allocation6 + $0x34] sm:$0xf0]  ;;  %v3079_v10 = vld [vmem:[%s4581_s30 + $0xb0] sm:$0xf] }
  0x73   : > { %962 = vmatpush.bf16.msrb.mxu1 %v3208_v32  ;;  %942 = vmatmul.bf16.gmra.mxu2 %v4627_v43  ;;  %v3196_v32 = vor.u32 %v4016_v18, %v3193_v19  ;;  %v3085_v23 = vld [vmem:[%s4581_s30 + $0xcc] sm:$0xf0] }
  0x74   : > { %1021 = vmatpush.bf16.msrb.mxu2 %v3272_v31  ;;  %952 = vmatmul.bf16.gmra.mxu3 %v4629_v44  ;;  %v3933_v31 = vld [vmem:[#allocation6 + $0x64] sm:$0xf0] }
  0x75   : > { %1080 = vmatpush.bf16.msrb.mxu3 %v3148_v45  ;;  %1139 = vmatpush.bf16.msrb.mxu0 %v3212_v63  ;;  %v3949_v45 = vld [vmem:[#allocation6 + $0xe4] sm:$0xf0]  ;;  %v3292_v63 = vor.u32 %v4040_v60, %v3289_v61  ;;  %v3983_v61 = vld [vmem:[%s4581_s30 + $0x94] sm:$0xf] }
  0x76   : > { %v3544_v53 = vor.u32 %v3949_v45, %v3543_v34  ;;  %v3273_v34 = vld [vmem:[#allocation6 + $0x2b8] sm:$0xf0]  ;;  %v3055_v45 = vld [vmem:[%s4581_s30 + $0x80] sm:$0xf] }
  0x77   : > { %963 = vmatpush.bf16.msrb.mxu1 %v3200_v52  ;;  %v3300_v52 = vor.u32 %v4042_v35, %v3297_v38 }
  0x78   : > { %1022 = vmatpush.bf16.msrb.mxu2 %v3264_v51  ;;  %v3480_v51 = vor.u32 %v3933_v31, %v3479_v30  ;;  %v3519_v30 = vld [vmem:[#allocation6 + $0xb0] sm:$0xf] }
  0x79   : > { %1081 = vmatpush.bf16.msrb.mxu3 %v3140_v59  ;;  %1140 = vmatpush.bf16.msrb.mxu0 %v3204_v14  ;;  %v3947_v59 = vld [vmem:[#allocation6 + $0xd4] sm:$0xf0]  ;;  %v3974_v14 = vld [vmem:[%s4581_s30 + $0x4c] sm:$0xf] }
  0x7a   : > { %v3536_v62 = vor.u32 %v3947_v59, %v3535_v57  ;;  %v4034_v57 = vld [vmem:[#allocation6 + $0x2a4] sm:$0xf]  ;;  %v3265_v59 = vld [vmem:[#allocation6 + $0x2a8] sm:$0xf0] }
  0x7b   : > { %964 = vmatpush.bf16.msrb.mxu1 %v3192_v1  ;;  %v3971_v1 = vld [vmem:[%s4581_s30 + $0x34] sm:$0xf]  ;;  %v3268_v60 = vor.u32 %v4034_v57, %v3265_v59  ;;  %v3103_v57 = vld [vmem:[%s4581_s30 + $0xe0] sm:$0xf] }
  0x7c   : > { %1023 = vmatpush.bf16.msrb.mxu2 %v3256_v0  ;;  %v3978_v0 = vld [vmem:[%s4581_s30 + $0x68] sm:$0xf0]  ;;  %v3016_v6 = vor.u32 %v3971_v1, %v3013_v2  ;;  %v3439_v1 = vld [vmem:[#allocation6 + $0x10] sm:$0xf]  ;;  %v3923_v2 = vld [vmem:[#allocation6 + $0x14] sm:$0xf0] }
  0x7d   : > { %1082 = vmatpush.bf16.msrb.mxu3 %v3132_v11  ;;  %1141 = vmatpush.bf16.msrb.mxu0 %v3196_v32  ;;  %v3464_v11 = vor.u32 %v3929_v9, %v3463_v8  ;;  %v3943_v32 = vld [vmem:[#allocation6 + $0xb4] sm:$0xf0]  ;;  %v3440_v4 = vor.u32 %v3923_v2, %v3439_v1  ;;  %v3986_v8 = vld [vmem:[%s4581_s30 + $0xac] sm:$0xf]  ;;  %v3073_v9 = vld [vmem:[%s4581_s30 + $0xb4] sm:$0xf0] }
  0x7e   : > { %v3520_v35 = vor.u32 %v3943_v32, %v3519_v30  ;;  %v3076_v12 = vor.u32 %v3986_v8, %v3073_v9  ;;  %v3431_v32 = vld [vmem:[#allocation6] sm:$0xf]  ;;  %v3967_v1 = vld [vmem:[#allocation6 + $0x174] sm:$0xf0]  ;;  %v3617_v8 = vld [vmem:[#allocation6 + $0x178] sm:$0xf0] }
  0x7f   : > { %965 = vmatpush.bf16.msrb.mxu1 %v3184_v16  ;;  %v3031_v16 = vld [vmem:[%s4581_s30 + $0x50] sm:$0xf] }
  0x80   : > { %1024 = vmatpush.bf16.msrb.mxu2 %v3248_v15  ;;  %v3025_v15 = vld [vmem:[%s4581_s30 + $0x54] sm:$0xf0]  ;;  %v4662_v19 = vor.u32 %v3976_v17, %v3031_v16 }
  0x81   : > { %1083 = vmatpush.bf16.msrb.mxu3 %v3124_v28  ;;  %1142 = vmatpush.bf16.msrb.mxu0 %v3188_v54  ;;  %v3028_v18 = vor.u32 %v3974_v14, %v3025_v15  ;;  %v3455_v28 = vld [vmem:[#allocation6 + $0x30] sm:$0xf]  ;;  %v3257_v14 = vld [vmem:[#allocation6 + $0x298] sm:$0xf0] }
  0x82   : > { %917 = vmatmul.bf16.gmra.mxu0 %v4641_v39  ;;  %966 = vmatmul.bf16.vlgmr.msrb.gmra.mxu1 %v3004_v40  ;;  %v3456_v31 = vor.u32 %v3927_v29, %v3455_v28  ;;  %v4715_v29 = vor.u32 %v3989_v22, %v3085_v23  ;;  %v3934_v22 = vld [vmem:[#allocation6 + $0x74] sm:$0xf]  ;;  %v3489_v23 = vld [vmem:[#allocation6 + $0x78] sm:$0xf0] }
  0x83   : > { %1194 = vmatpush.bf16.msra.mxu1 %v3308_v24  ;;  %1025 = vmatmul.bf16.vlgmr.msrb.gmra.mxu2 %v4643_v50  ;;  %v3043_v24 = vld [vmem:[%s4581_s30 + $0x68] sm:$0xf] }
  0x84   : > { %1653 = vmatpush.bf16.msra.mxu2 %v3488_v21  ;;  %1084 = vmatmul.bf16.vlgmr.msrb.gmra.mxu3 %v4603_v41  ;;  %v3035_v41 = vld [vmem:[%s4581_s30 + $0x60] sm:$0xf]  ;;  %v4670_v27 = vor.u32 %v3979_v25, %v3043_v24  ;;  %v3091_v24 = vld [vmem:[%s4581_s30 + $0xc8] sm:$0xf]  ;;  %v3991_v25 = vld [vmem:[%s4581_s30 + $0xd0] sm:$0xf0] }
  0x85   : > { %1712 = vmatpush.bf16.msra.mxu3 %v3552_v33  ;;  %v3036_v5 = vor.u32 %v3978_v0, %v3035_v41  ;;  %v4036_v33 = vld [vmem:[#allocation6 + $0x2b4] sm:$0xf] }
  0x86   : > { %v3276_v38 = vor.u32 %v4036_v33, %v3273_v34  ;;  %v3985_v41 = vld [vmem:[%s4581_s30 + $0xa0] sm:$0xf0]  ;;  %v3921_v33 = vld [vmem:[#allocation6 + $0x4] sm:$0xf0] }
  0x87   : > { %1195 = vmatpush.bf16.msra.mxu1 %v3300_v52  ;;  %v3447_v52 = vld [vmem:[#allocation6 + $0x20] sm:$0xf]  ;;  %v3432_v34 = vor.u32 %v3921_v33, %v3431_v32  ;;  %v3599_v32 = vld [vmem:[#allocation6 + $0x150] sm:$0xf]  ;;  %v3963_v33 = vld [vmem:[#allocation6 + $0x154] sm:$0xf0] }
  0x88   : > { %1654 = vmatpush.bf16.msra.mxu2 %v3480_v51  ;;  %v4677_v51 = vor.u32 %v3982_v48, %v3055_v45  ;;  %v3249_v45 = vld [vmem:[#allocation6 + $0x288] sm:$0xf0] }
  0x89   : > { %1713 = vmatpush.bf16.msra.mxu3 %v3544_v53  ;;  %v3925_v53 = vld [vmem:[#allocation6 + $0x24] sm:$0xf0] }
  0x8a   : > { %v3448_v54 = vor.u32 %v3925_v53, %v3447_v52 }
  0x8b   : > { %1196 = vmatpush.bf16.msra.mxu1 %v3292_v63  ;;  %v3067_v63 = vld [vmem:[%s4581_s30 + $0x98] sm:$0xf] }
  0x8c   : > { %1655 = vmatpush.bf16.msra.mxu2 %v3472_v58  ;;  %v3512_v58 = vor.u32 %v3941_v56, %v3511_v55  ;;  %v4685_v0 = vor.u32 %v3985_v41, %v3067_v63  ;;  %v3992_v55 = vld [vmem:[%s4581_s30 + $0xdc] sm:$0xf]  ;;  %v3097_v56 = vld [vmem:[%s4581_s30 + $0xe4] sm:$0xf0] }
  0x8d   : > { %1714 = vmatpush.bf16.msra.mxu3 %v3536_v62  ;;  %v3061_v62 = vld [vmem:[%s4581_s30 + $0x9c] sm:$0xf0] }
  0x90   : > { %1656 = vmatpush.bf16.msra.mxu2 %v3464_v11  ;;  %v3988_v11 = vld [vmem:[%s4581_s30 + $0xb8] sm:$0xf0] }
  0x91   : > { %1715 = vmatpush.bf16.msra.mxu3 %v3528_v13  ;;  %v4032_v13 = vld [vmem:[#allocation6 + $0x294] sm:$0xf]  ;;  %v4695_v16 = vor.u32 %v3988_v11, %v3079_v10  ;;  %v3607_v10 = vld [vmem:[#allocation6 + $0x160] sm:$0xf]  ;;  %v3965_v11 = vld [vmem:[#allocation6 + $0x164] sm:$0xf0] }
  0x92   : > { %922 = vmatmul.bf16.gmra.mxu0 %v3036_v5  ;;  %971 = vmatmul.bf16.gmra.mxu1 %v3016_v6  ;;  %v3260_v17 = vor.u32 %v4032_v13, %v3257_v14 }
  0x93   : > { %1030 = vmatmul.bf16.gmra.mxu2 %v4654_v7 }
  0x94   : > { %1089 = vmatmul.bf16.gmra.mxu3 %v4623_v36  ;;  %v4038_v36 = vld [vmem:[#allocation6 + $0x2c4] sm:$0xf]  ;;  %1657 = vmatpush.bf16.msra.mxu2 %v3456_v31  ;;  %v4721_v31 = vor.u32 %v3991_v25, %v3091_v24  ;;  %v3492_v25 = vor.u32 %v3934_v22, %v3489_v23 }
  0x95   : > { %v3284_v21 = vor.u32 %v4038_v36, %v3281_v20  ;;  %1716 = vmatpush.bf16.msra.mxu3 %v3520_v35  ;;  %v3495_v35 = vld [vmem:[#allocation6 + $0x80] sm:$0xf]  ;;  %v3932_v22 = vld [vmem:[#allocation6 + $0x64] sm:$0xf] }
  0x97   : > { %1197 = vmatpush.bf16.msra.mxu1 %v3284_v21 }
  0x98   : > { %1658 = vmatpush.bf16.msra.mxu2 %v3448_v54 }
  0x99   : > { %1717 = vmatpush.bf16.msra.mxu3 %v3512_v58  ;;  %v3994_v58 = vld [vmem:[%s4581_s30 + $0xe8] sm:$0xf0] }
  0x9a   : > { %v4742_v63 = vor.u32 %v3994_v58, %v3103_v57 }
  0x9b   : > { %1198 = vmatpush.bf16.msra.mxu1 %v3276_v38  ;;  %v3937_v38 = vld [vmem:[#allocation6 + $0x84] sm:$0xf0] }
  0x9c   : > { %1659 = vmatpush.bf16.msra.mxu2 %v3440_v4  ;;  %v3553_v4 = vld [vmem:[#allocation6 + $0xf8] sm:$0xf0] }
  0x9f   : > { %1199 = vmatpush.bf16.msra.mxu1 %v3268_v60  ;;  %v4738_v60 = vor.u32 %v3992_v55, %v3097_v56 }
  0xa0   : > { %1660 = vmatpush.bf16.msra.mxu2 %v3432_v34  ;;  %v3600_v34 = vor.u32 %v3963_v33, %v3599_v32  ;;  %v3955_v32 = vld [vmem:[#allocation6 + $0x114] sm:$0xf0] }
  0xa2   : > { %976 = vmatmul.bf16.gmra.mxu1 %v3028_v18  ;;  %1143 = vmatmul.bf16.vlgmr.msrb.gmra.mxu0 %v3004_v40  ;;  %v3049_v40 = vld [vmem:[%s4581_s30 + $0x84] sm:$0xf0] }
  0xa3   : > { %1035 = vmatmul.bf16.gmra.mxu2 %v4662_v19  ;;  %1200 = vmatpush.bf16.msra.mxu1 %v3260_v17 }
  0xa4   : > { %1094 = vmatmul.bf16.gmra.mxu3 %v4641_v39  ;;  %v3980_v39 = vld [vmem:[%s4581_s30 + $0x7c] sm:$0xf] }
  0xa5   : > { %v3052_v49 = vor.u32 %v3980_v39, %v3049_v40  ;;  %v3496_v39 = vor.u32 %v3937_v38, %v3495_v35  ;;  %v4030_v40 = vld [vmem:[#allocation6 + $0x284] sm:$0xf]  ;;  %v3109_v38 = vld [vmem:[%s4581_s30 + $0xfc] sm:$0xf0] }
  0xa6   : > { %v3252_v48 = vor.u32 %v4030_v40, %v3249_v45  ;;  %v3995_v35 = vld [vmem:[%s4581_s30 + $0xf4] sm:$0xf]  ;;  %v3997_v40 = vld [vmem:[%s4581_s30 + $0x100] sm:$0xf0]  ;;  %v3591_v45 = vld [vmem:[#allocation6 + $0x140] sm:$0xf] }
  0xa7   : > { %v4760_v56 = vor.u32 %v3995_v35, %v3109_v38  ;;  %v3311_v35 = vld [vmem:[%s4581_s30] sm:$0xf]  ;;  %v3891_v38 = vld [vmem:[%s4581_s30 + $0x8] sm:$0xf0] }
  0xa8   : > { %1201 = vmatpush.bf16.msra.mxu1 %v3252_v48  ;;  %v3961_v48 = vld [vmem:[#allocation6 + $0x144] sm:$0xf0] }
  0xa9   : > { %v3592_v57 = vor.u32 %v3961_v48, %v3591_v45  ;;  %v3953_v45 = vld [vmem:[#allocation6 + $0x104] sm:$0xf0] }
  0xac   : > { %1830 = vmatpush.bf16.msrb.mxu1 %v3492_v25  ;;  %v3567_v25 = vld [vmem:[#allocation6 + $0x110] sm:$0xf] }
  0xb2   : > { %981 = vmatmul.bf16.gmra.mxu1 %v3040_v26  ;;  %1148 = vmatmul.bf16.gmra.mxu0 %v3016_v6 }
  0xb3   : > { %1040 = vmatmul.bf16.gmra.mxu2 %v4670_v27 }
  0xb4   : > { %1099 = vmatmul.bf16.gmra.mxu3 %v3036_v5  ;;  %v3939_v5 = vld [vmem:[#allocation6 + $0x94] sm:$0xf0] }
  0xb5   : > { %v3504_v6 = vor.u32 %v3939_v5, %v3503_v3  ;;  %v3950_v3 = vld [vmem:[#allocation6 + $0xf4] sm:$0xf] }
  0xb6   : > { %v3966_v5 = vld [vmem:[#allocation6 + $0x174] sm:$0xf] }
  0xb7   : > { %1718 = vmatpush.bf16.msra.mxu3 %v3504_v6  ;;  %v3556_v6 = vor.u32 %v3950_v3, %v3553_v4  ;;  %v3620_v9 = vor.u32 %v3966_v5, %v3617_v8  ;;  %v3575_v3 = vld [vmem:[#allocation6 + $0x120] sm:$0xf]  ;;  %v3957_v4 = vld [vmem:[#allocation6 + $0x124] sm:$0xf0] }
  0xb8   : > { %v3576_v8 = vor.u32 %v3957_v4, %v3575_v3 }
  0xb9   : > { %1889 = vmatpush.bf16.msrb.mxu2 %v3556_v6 }
  0xbb   : > { %1719 = vmatpush.bf16.msra.mxu3 %v3496_v39  ;;  %v3115_v39 = vld [vmem:[%s4581_s30 + $0xf8] sm:$0xf] }
  0xbf   : > { %1948 = vmatpush.bf16.msrb.mxu3 %v3620_v9 }
  0xc2   : > { %986 = vmatmul.bf16.gmra.mxu1 %v3052_v49  ;;  %1153 = vmatmul.bf16.gmra.mxu0 %v3028_v18 }
  0xc3   : > { %1045 = vmatmul.bf16.gmra.mxu2 %v4677_v51 }
  0xc4   : > { %1104 = vmatmul.bf16.gmra.mxu3 %v4605_v42  ;;  %v3064_v42 = vor.u32 %v3983_v61, %v3061_v62 }
  0xd2   : > { %991 = vmatmul.bf16.gmra.mxu1 %v3064_v42  ;;  %1158 = vmatmul.bf16.gmra.mxu0 %v3040_v26 }
  0xd3   : > { %1050 = vmatmul.bf16.gmra.mxu2 %v4685_v0 }
  0xd4   : > { %1109 = vmatmul.bf16.gmra.mxu3 %v4625_v37 }
  0xdf   : > { %v908_v15 = vpop.f32.mrf.mxu0  ;;  %v4693_v37 = vpop.f32.mrf.mxu1 }
  0xe2   : > { %996 = vmatmul.bf16.gmra.mxu1 %v3076_v12  ;;  %1163 = vmatmul.bf16.gmra.mxu0 %v3052_v49 }
  0xe3   : > { %1055 = vmatmul.bf16.gmra.mxu2 %v4695_v16 }
  0xe4   : > { %1114 = vmatmul.bf16.gmra.mxu3 %v4607_v46 }
  0xe6   : > { %v4699_v18 = vpop.f32.mrf.mxu2 }
  0xe7   : > { %v4701_v36 = vpop.f32.mrf.mxu3  ;;  %v4703_v20 = vpop.f32.mrf.mxu0 }
  0xe8   : > { %v4705_v21 = vpop.f32.mrf.mxu1 }
  0xee   : > { %v4711_v26 = vpop.f32.mrf.mxu2 }
  0xef   : > { %v4713_v28 = vpop.f32.mrf.mxu3  ;;  %v4717_v30 = vpop.f32.mrf.mxu0 }
  0xf0   : > { %v4719_v46 = vpop.f32.mrf.mxu1 }
  0xf2   : > { %1001 = vmatmul.bf16.gmra.mxu1 %v4715_v29  ;;  %1168 = vmatmul.bf16.gmra.mxu0 %v3064_v42  ;;  %v3615_v42 = vld [vmem:[#allocation6 + $0x170] sm:$0xf] }
  0xf3   : > { %1060 = vmatmul.bf16.gmra.mxu2 %v4721_v31  ;;  %v3616_v2 = vor.u32 %v3967_v1, %v3615_v42  ;;  %v3583_v42 = vld [vmem:[#allocation6 + $0x130] sm:$0xf]  ;;  %v3959_v1 = vld [vmem:[#allocation6 + $0x134] sm:$0xf0] }
  0xf4   : > { %1119 = vmatmul.bf16.gmra.mxu3 %v4627_v43 }
  0xf5   : > { %1771 = vmatpush.bf16.msra.mxu0 %v3616_v2  ;;  %v3584_v2 = vor.u32 %v3959_v1, %v3583_v42  ;;  %v4786_v1 = vor.u32 %v3891_v38, %v3311_v35 }
  0xf6   : > { %v4726_v49 = vpop.f32.mrf.mxu2 }
  0xf7   : > { %v953_v52 = vpop.f32.mrf.mxu3  ;;  %v4728_v53 = vpop.f32.mrf.mxu0 }
  0xf8   : > { %v4730_v54 = vpop.f32.mrf.mxu1 }
  0xfe   : > { %v4736_v59 = vpop.f32.mrf.mxu2 }
  0xff   : > { %v955_v43 = vpop.f32.mrf.mxu3  ;;  %v4740_v61 = vpop.f32.mrf.mxu0 }
 0x100   : > { %v967_v62 = vpop.f32.mrf.mxu1 }
 0x101   : > { %v968_v41 = vadd.f32 %v967_v62, %v908_v15  ;;  %v4766_v62 = vor.u32 %v3997_v40, %v3115_v39  ;;  %v3890_v39 = vld [vmem:[%s4581_s30 + $0x4] sm:$0xf]  ;;  %v3313_v40 = vld [vmem:[%s4581_s30 + $0xc] sm:$0xf0] }
 0x102   : > { %1006 = vmatmul.bf16.gmra.mxu1 %v4738_v60  ;;  %1173 = vmatmul.bf16.gmra.mxu0 %v3076_v12  ;;  %v3608_v12 = vor.u32 %v3965_v11, %v3607_v10  ;;  %v3948_v11 = vld [vmem:[#allocation6 + $0xe4] sm:$0xf] }
 0x103   : > { %1065 = vmatmul.bf16.gmra.mxu2 %v4742_v63 }
 0x104   : > { %1124 = vmatmul.bf16.gmra.mxu3 %v4609_v47  ;;  %1772 = vmatpush.bf16.msra.mxu0 %v3608_v12  ;;  %v3964_v12 = vld [vmem:[#allocation6 + $0x164] sm:$0xf] }
 0x106   : > { %v1026_v13 = vpop.f32.mrf.mxu2 }
 0x107   : > { %v4747_v14 = vpop.f32.mrf.mxu3  ;;  %v4749_v15 = vadd.f32 %v1026_v13, %v968_v41  ;;  %v4751_v47 = vpop.f32.mrf.mxu0 }
 0x108   : > { %v969_v17 = vpop.f32.mrf.mxu1  ;;  %1773 = vmatpush.bf16.msra.mxu0 %v3600_v34  ;;  %v3568_v34 = vor.u32 %v3955_v32, %v3567_v25  ;;  %v3325_v25 = vld [vmem:[%s4581_s30 + $0x24] sm:$0xf0] }
 0x109   : > { %v970_v24 = vadd.f32 %v969_v17, %v4703_v20  ;;  %v3609_v17 = vld [vmem:[#allocation6 + $0x168] sm:$0xf0] }
 0x10a   : > { %v3612_v23 = vor.u32 %v3964_v12, %v3609_v17  ;;  %v3601_v12 = vld [vmem:[#allocation6 + $0x158] sm:$0xf0] }
 0x10c   : > { %1774 = vmatpush.bf16.msra.mxu0 %v3592_v57  ;;  %1949 = vmatpush.bf16.msrb.mxu3 %v3612_v23  ;;  %v3894_v23 = vld [vmem:[%s4581_s30 + $0x20] sm:$0xf0] }
 0x10e   : > { %v1028_v52 = vpop.f32.mrf.mxu2 }
 0x10f   : > { %v4758_v55 = vpop.f32.mrf.mxu3  ;;  %v4762_v20 = vadd.f32 %v1028_v52, %v970_v24  ;;  %v4764_v58 = vpop.f32.mrf.mxu0  ;;  %v3481_v24 = vld [vmem:[#allocation6 + $0x68] sm:$0xf0] }
 0x110   : > { %v972_v43 = vpop.f32.mrf.mxu1  ;;  %1775 = vmatpush.bf16.msra.mxu0 %v3584_v2  ;;  %v3484_v33 = vor.u32 %v3932_v22, %v3481_v24  ;;  %v4788_v2 = vor.u32 %v3890_v39, %v3313_v40  ;;  %v3323_v22 = vld [vmem:[%s4581_s30 + $0x18] sm:$0xf]  ;;  %v3893_v24 = vld [vmem:[%s4581_s30 + $0x1c] sm:$0xf]  ;;  %v3473_v40 = vld [vmem:[#allocation6 + $0x58] sm:$0xf0] }
 0x111   : > { %v973_v41 = vadd.f32 %v972_v43, %v4717_v30  ;;  %v4812_v38 = vor.u32 %v3893_v24, %v3325_v25  ;;  %v3930_v39 = vld [vmem:[#allocation6 + $0x54] sm:$0xf]  ;;  %v3529_v24 = vld [vmem:[#allocation6 + $0xc8] sm:$0xf0] }
 0x112   : > { %1011 = vmatmul.bf16.gmra.mxu1 %v4760_v56  ;;  %1178 = vmatmul.bf16.gmra.mxu0 %v4715_v29  ;;  %v3545_v29 = vld [vmem:[#allocation6 + $0xe8] sm:$0xf0] }
 0x113   : > { %1070 = vmatmul.bf16.gmra.mxu2 %v4766_v62  ;;  %1831 = vmatpush.bf16.msrb.mxu1 %v3484_v33 }
 0x114   : > { %1129 = vmatmul.bf16.gmra.mxu3 %v4629_v44  ;;  %v3548_v44 = vor.u32 %v3948_v11, %v3545_v29  ;;  %1776 = vmatpush.bf16.msra.mxu0 %v3576_v8  ;;  %v3537_v29 = vld [vmem:[#allocation6 + $0xd8] sm:$0xf0] }
 0x116   : > { %v1031_v5 = vpop.f32.mrf.mxu2  ;;  %1890 = vmatpush.bf16.msrb.mxu2 %v3548_v44 }
 0x117   : > { %v4773_v6 = vpop.f32.mrf.mxu3  ;;  %v4775_v30 = vadd.f32 %v1031_v5, %v973_v41  ;;  %v4777_v9 = vpop.f32.mrf.mxu0 }
 0x118   : > { %v974_v10 = vpop.f32.mrf.mxu1  ;;  %1777 = vmatpush.bf16.msra.mxu0 %v3568_v34 }
 0x119   : > { %v975_v13 = vadd.f32 %v974_v10, %v4728_v53  ;;  %v3559_v53 = vld [vmem:[#allocation6 + $0x100] sm:$0xf] }
 0x11a   : > { %v3560_v57 = vor.u32 %v3953_v45, %v3559_v53 }
 0x11c   : > { %1778 = vmatpush.bf16.msra.mxu0 %v3560_v57 }
 0x11e   : > { %v1033_v48 = vpop.f32.mrf.mxu2 }
 0x11f   : > { %v1092_v52 = vpop.f32.mrf.mxu3  ;;  %v4784_v43 = vadd.f32 %v1033_v48, %v975_v13  ;;  %v1144_v42 = vpop.f32.mrf.mxu0  ;;  %v3962_v13 = vld [vmem:[#allocation6 + $0x154] sm:$0xf]  ;;  %v3476_v48 = vor.u32 %v3930_v39, %v3473_v40  ;;  %v3928_v40 = vld [vmem:[#allocation6 + $0x44] sm:$0xf] }
 0x120   : > { %v977_v41 = vpop.f32.mrf.mxu1  ;;  %v4792_v4 = vadd.f32 %v1144_v42, %v4747_v14  ;;  %v3604_v17 = vor.u32 %v3962_v13, %v3601_v12 }
 0x121   : > { %v978_v3 = vadd.f32 %v977_v41, %v4740_v61  ;;  %1832 = vmatpush.bf16.msrb.mxu1 %v3476_v48 }
 0x122   : > { %1183 = vmatmul.bf16.gmra.mxu0 %v4738_v60  ;;  %1202 = vmatmul.bf16.vlgmr.msra.gmra.mxu1 %v4643_v50  ;;  %v3946_v50 = vld [vmem:[#allocation6 + $0xd4] sm:$0xf] }
 0x123   : > { %1661 = vmatmul.bf16.vlgmr.msra.gmra.mxu2 %v4786_v1  ;;  %v3540_v44 = vor.u32 %v3946_v50, %v3537_v29  ;;  %1950 = vmatpush.bf16.msrb.mxu3 %v3604_v17  ;;  %v3337_v50 = vld [vmem:[%s4581_s30 + $0x3c] sm:$0xf0] }
 0x124   : > { %1720 = vmatmul.bf16.vlgmr.msra.gmra.mxu3 %v4788_v2 }
 0x125   : > { %1891 = vmatpush.bf16.msrb.mxu2 %v3540_v44 }
 0x126   : > { %v1036_v5 = vpop.f32.mrf.mxu2 }
 0x127   : > { %v1095_v8 = vpop.f32.mrf.mxu3  ;;  %v4798_v10 = vadd.f32 %v1036_v5, %v978_v3  ;;  %v1146_v14 = vpop.f32.mrf.mxu0 }
 0x128   : > { %v979_v61 = vpop.f32.mrf.mxu1  ;;  %v4802_v60 = vadd.f32 %v1146_v14, %v4758_v55  ;;  %v4810_v55 = vor.u32 %v3894_v23, %v3323_v22  ;;  %v3892_v14 = vld [vmem:[%s4581_s30 + $0x10] sm:$0xf0] }
 0x129   : > { %v980_v11 = vadd.f32 %v979_v61, %v4751_v47  ;;  %v3319_v61 = vld [vmem:[%s4581_s30 + $0x8] sm:$0xf] }
 0x12a   : > { %v4835_v44 = vor.u32 %v3892_v14, %v3319_v61  ;;  %v3347_v61 = vld [vmem:[%s4581_s30 + $0x48] sm:$0xf]  ;;  %v3331_v14 = vld [vmem:[%s4581_s30 + $0x20] sm:$0xf] }
 0x12e   : > { %v1038_v32 = vpop.f32.mrf.mxu2 }
 0x12f   : > { %v1097_v33 = vpop.f32.mrf.mxu3  ;;  %v4808_v34 = vadd.f32 %v1038_v32, %v980_v11  ;;  %v1149_v35 = vpop.f32.mrf.mxu0  ;;  %v3896_v11 = vld [vmem:[%s4581_s30 + $0x34] sm:$0xf] }
 0x130   : > { %v982_v47 = vpop.f32.mrf.mxu1  ;;  %v4816_v45 = vadd.f32 %v1149_v35, %v4773_v6  ;;  %v3593_v35 = vld [vmem:[#allocation6 + $0x148] sm:$0xf0] }
 0x131   : > { %v983_v53 = vadd.f32 %v982_v47, %v4764_v58  ;;  %v3960_v47 = vld [vmem:[#allocation6 + $0x144] sm:$0xf] }
 0x132   : > { %1188 = vmatmul.bf16.gmra.mxu0 %v4760_v56  ;;  %1207 = vmatmul.bf16.gmra.mxu1 %v4654_v7  ;;  %v3335_v56 = vld [vmem:[%s4581_s30 + $0x30] sm:$0xf]  ;;  %v3897_v7 = vld [vmem:[%s4581_s30 + $0x38] sm:$0xf0]  ;;  %v3596_v39 = vor.u32 %v3960_v47, %v3593_v35 }
 0x133   : > { %1666 = vmatmul.bf16.gmra.mxu2 %v4810_v55  ;;  %v4839_v23 = vor.u32 %v3897_v7, %v3335_v56  ;;  %v3895_v7 = vld [vmem:[%s4581_s30 + $0x28] sm:$0xf0] }
 0x134   : > { %1725 = vmatmul.bf16.gmra.mxu3 %v4812_v38 }
 0x135   : > { %1951 = vmatpush.bf16.msrb.mxu3 %v3596_v39 }
 0x136   : > { %v1041_v57 = vpop.f32.mrf.mxu2 }
 0x137   : > { %v1100_v58 = vpop.f32.mrf.mxu3  ;;  %v4822_v41 = vadd.f32 %v1041_v57, %v983_v53  ;;  %v1151_v42 = vpop.f32.mrf.mxu0  ;;  %v3465_v53 = vld [vmem:[#allocation6 + $0x48] sm:$0xf0] }
 0x138   : > { %v984_v6 = vpop.f32.mrf.mxu1  ;;  %v4825_v5 = vadd.f32 %v1151_v42, %v1092_v52  ;;  %v3944_v52 = vld [vmem:[#allocation6 + $0xc4] sm:$0xf] }
 0x139   : > { %v985_v3 = vadd.f32 %v984_v6, %v4777_v9  ;;  %v4841_v9 = vor.u32 %v3896_v11, %v3337_v50  ;;  %v3532_v32 = vor.u32 %v3944_v52, %v3529_v24  ;;  %v3900_v11 = vld [vmem:[%s4581_s30 + $0x50] sm:$0xf0]  ;;  %v3899_v50 = vld [vmem:[%s4581_s30 + $0x4c] sm:$0xf] }
 0x13a   : > { %v4865_v35 = vor.u32 %v3900_v11, %v3347_v61  ;;  %v3457_v11 = vld [vmem:[#allocation6 + $0x38] sm:$0xf0] }
 0x13b   : > { %1892 = vmatpush.bf16.msrb.mxu2 %v3532_v32 }
 0x13e   : > { %v1043_v29 = vpop.f32.mrf.mxu2 }
 0x13f   : > { %v4833_v13 = vpop.f32.mrf.mxu3  ;;  %v4837_v12 = vadd.f32 %v1043_v29, %v985_v3  ;;  %v1154_v22 = vpop.f32.mrf.mxu0  ;;  %v3349_v29 = vld [vmem:[%s4581_s30 + $0x54] sm:$0xf0] }
 0x140   : > { %v987_v17 = vpop.f32.mrf.mxu1  ;;  %v4843_v25 = vadd.f32 %v1154_v22, %v1095_v8  ;;  %v3468_v8 = vor.u32 %v3928_v40, %v3465_v53  ;;  %v3521_v40 = vld [vmem:[#allocation6 + $0xb8] sm:$0xf0]  ;;  %v3958_v53 = vld [vmem:[#allocation6 + $0x134] sm:$0xf] }
 0x141   : > { %v988_v48 = vadd.f32 %v987_v17, %v4693_v37  ;;  %v4861_v37 = vor.u32 %v3895_v7, %v3331_v14  ;;  %v3926_v7 = vld [vmem:[#allocation6 + $0x34] sm:$0xf] }
 0x142   : > { %1212 = vmatmul.bf16.gmra.mxu1 %v4662_v19  ;;  %1779 = vmatmul.bf16.vlgmr.msra.gmra.mxu0 %v4835_v44 }
 0x143   : > { %1671 = vmatmul.bf16.gmra.mxu2 %v4839_v23  ;;  %1833 = vmatpush.bf16.msrb.mxu1 %v3468_v8 }
 0x144   : > { %1730 = vmatmul.bf16.gmra.mxu3 %v4841_v9 }
 0x146   : > { %v1046_v19 = vpop.f32.mrf.mxu2 }
 0x147   : > { %v1105_v57 = vpop.f32.mrf.mxu3  ;;  %v4850_v6 = vadd.f32 %v1046_v19, %v988_v48  ;;  %v1156_v3 = vpop.f32.mrf.mxu0  ;;  %v3585_v48 = vld [vmem:[#allocation6 + $0x138] sm:$0xf0] }
 0x148   : > { %v989_v42 = vpop.f32.mrf.mxu1  ;;  %v4852_v56 = vadd.f32 %v1156_v3, %v1097_v33  ;;  %v4867_v33 = vor.u32 %v3899_v50, %v3349_v29  ;;  %v3359_v29 = vld [vmem:[%s4581_s30 + $0x60] sm:$0xf] }
 0x149   : > { %v990_v22 = vadd.f32 %v989_v42, %v4705_v21  ;;  %v3942_v21 = vld [vmem:[#allocation6 + $0xb4] sm:$0xf] }
 0x14a   : > { %v3524_v8 = vor.u32 %v3942_v21, %v3521_v40  ;;  %v3361_v21 = vld [vmem:[%s4581_s30 + $0x6c] sm:$0xf0] }
 0x14c   : > { %1893 = vmatpush.bf16.msrb.mxu2 %v3524_v8 }
 0x14e   : > { %v1048_v52 = vpop.f32.mrf.mxu2 }
 0x14f   : > { %v1107_v24 = vpop.f32.mrf.mxu3  ;;  %v4863_v17 = vadd.f32 %v1048_v52, %v990_v22  ;;  %v1159_v47 = vpop.f32.mrf.mxu0  ;;  %v3343_v22 = vld [vmem:[%s4581_s30 + $0x38] sm:$0xf]  ;;  %v3898_v52 = vld [vmem:[%s4581_s30 + $0x40] sm:$0xf0] }
 0x150   : > { %v992_v32 = vpop.f32.mrf.mxu1  ;;  %v4869_v39 = vadd.f32 %v1159_v47, %v1100_v58  ;;  %v3588_v58 = vor.u32 %v3958_v53, %v3585_v48  ;;  %v3902_v47 = vld [vmem:[%s4581_s30 + $0x64] sm:$0xf]  ;;  %v4890_v48 = vor.u32 %v3898_v52, %v3343_v22  ;;  %v3513_v22 = vld [vmem:[#allocation6 + $0xa8] sm:$0xf0] }
 0x151   : > { %v993_v19 = vadd.f32 %v992_v32, %v4719_v46  ;;  %v3460_v46 = vor.u32 %v3926_v7, %v3457_v11  ;;  %v3903_v32 = vld [vmem:[%s4581_s30 + $0x68] sm:$0xf0] }
 0x152   : > { %1217 = vmatmul.bf16.gmra.mxu1 %v4670_v27  ;;  %1784 = vmatmul.bf16.gmra.mxu0 %v4861_v37 }
 0x153   : > { %1676 = vmatmul.bf16.gmra.mxu2 %v4865_v35  ;;  %1952 = vmatpush.bf16.msrb.mxu3 %v3588_v58 }
 0x154   : > { %1735 = vmatmul.bf16.gmra.mxu3 %v4867_v33  ;;  %1834 = vmatpush.bf16.msrb.mxu1 %v3460_v46 }
 0x156   : > { %v1051_v42 = vpop.f32.mrf.mxu2 }
 0x157   : > { %v4876_v27 = vpop.f32.mrf.mxu3  ;;  %v4878_v3 = vadd.f32 %v1051_v42, %v993_v19  ;;  %v1161_v14 = vpop.f32.mrf.mxu0 }
 0x158   : > { %v994_v61 = vpop.f32.mrf.mxu1  ;;  %v4881_v50 = vadd.f32 %v1161_v14, %v4833_v13  ;;  %v4894_v13 = vor.u32 %v3903_v32, %v3359_v29  ;;  %v4896_v14 = vor.u32 %v3902_v47, %v3361_v21  ;;  %v3956_v47 = vld [vmem:[#allocation6 + $0x124] sm:$0xf] }
 0x159   : > { %v995_v40 = vadd.f32 %v994_v61, %v4730_v54  ;;  %v3924_v21 = vld [vmem:[#allocation6 + $0x24] sm:$0xf] }
 0x15a   : > { %5388 = vst [vmem:[#allocation17_spill] sm:$0xff] %v4894_v13 }
 0x15b   : > { %5389 = vst [vmem:[#allocation18_spill] sm:$0xff] %v4896_v14 }
 0x15e   : > { %v1053_v53 = vpop.f32.mrf.mxu2 }
 0x15f   : > { %v1112_v8 = vpop.f32.mrf.mxu3  ;;  %v4892_v19 = vadd.f32 %v1053_v53, %v995_v40  ;;  %v1164_v42 = vpop.f32.mrf.mxu0  ;;  %v3449_v53 = vld [vmem:[#allocation6 + $0x28] sm:$0xf0] }
 0x160   : > { %v997_v58 = vpop.f32.mrf.mxu1  ;;  %v4898_v7 = vadd.f32 %v1164_v42, %v1105_v57  ;;  %v3371_v42 = vld [vmem:[%s4581_s30 + $0x78] sm:$0xf] }
 0x161   : > { %5387 = vst [vmem:[#allocation16_spill] sm:$0xff] %v4892_v19  ;;  %v998_v54 = vadd.f32 %v997_v58, %v4699_v18  ;;  %v3577_v18 = vld [vmem:[#allocation6 + $0x128] sm:$0xf0]  ;;  %v3452_v58 = vor.u32 %v3924_v21, %v3449_v53  ;;  %v3505_v53 = vld [vmem:[#allocation6 + $0x98] sm:$0xf0] }
 0x162   : > { %1222 = vmatmul.bf16.gmra.mxu1 %v4677_v51  ;;  %1789 = vmatmul.bf16.gmra.mxu0 %v4890_v48  ;;  %v3940_v51 = vld [vmem:[#allocation6 + $0xa4] sm:$0xf]  ;;  %v3580_v40 = vor.u32 %v3956_v47, %v3577_v18 }
 0x163   : > { %1681 = vmatmul.bf16.gmra.mxu2 %v4894_v13  ;;  %v3516_v32 = vor.u32 %v3940_v51, %v3513_v22  ;;  %v3373_v13 = vld [vmem:[%s4581_s30 + $0x84] sm:$0xf0]  ;;  %1835 = vmatpush.bf16.msrb.mxu1 %v3452_v58  ;;  %v3954_v58 = vld [vmem:[#allocation6 + $0x114] sm:$0xf] }
 0x164   : > { %1740 = vmatmul.bf16.gmra.mxu3 %v4896_v14  ;;  %v3905_v14 = vld [vmem:[%s4581_s30 + $0x7c] sm:$0xf] }
 0x165   : > { %1894 = vmatpush.bf16.msrb.mxu2 %v3516_v32  ;;  %1953 = vmatpush.bf16.msrb.mxu3 %v3580_v40  ;;  %v4924_v21 = vor.u32 %v3905_v14, %v3373_v13 }
 0x166   : > { %v1056_v61 = vpop.f32.mrf.mxu2 }
 0x167   : > { %v4905_v11 = vpop.f32.mrf.mxu3  ;;  %v4907_v46 = vadd.f32 %v1056_v61, %v998_v54  ;;  %v1166_v29 = vpop.f32.mrf.mxu0  ;;  %v3355_v54 = vld [vmem:[%s4581_s30 + $0x50] sm:$0xf]  ;;  %v3901_v61 = vld [vmem:[%s4581_s30 + $0x58] sm:$0xf0]  ;;  %5393 = vst [vmem:[#allocation22_spill] sm:$0xff] %v4924_v21 }
 0x168   : > { %v999_v57 = vpop.f32.mrf.mxu1  ;;  %v4909_v52 = vadd.f32 %v1166_v29, %v1107_v24  ;;  %v4918_v51 = vor.u32 %v3901_v61, %v3355_v54  ;;  %v3569_v54 = vld [vmem:[#allocation6 + $0x118] sm:$0xf0] }
 0x169   : > { %5390 = vst [vmem:[#allocation19_spill] sm:$0xff] %v4907_v46  ;;  %v3906_v46 = vld [vmem:[%s4581_s30 + $0x80] sm:$0xf0]  ;;  %v1000_v19 = vadd.f32 %v999_v57, %v4711_v26  ;;  %v3572_v61 = vor.u32 %v3954_v58, %v3569_v54 }
 0x16a   : > { %v4922_v32 = vor.u32 %v3906_v46, %v3371_v42  ;;  %v3938_v57 = vld [vmem:[#allocation6 + $0x94] sm:$0xf] }
 0x16b   : > { %v3508_v42 = vor.u32 %v3938_v57, %v3505_v53  ;;  %1954 = vmatpush.bf16.msrb.mxu3 %v3572_v61  ;;  %v3922_v54 = vld [vmem:[#allocation6 + $0x14] sm:$0xf] }
 0x16c   : > { %5392 = vst [vmem:[#allocation21_spill] sm:$0xff] %v4922_v32 }
 0x16d   : > { %1895 = vmatpush.bf16.msrb.mxu2 %v3508_v42  ;;  %v3441_v42 = vld [vmem:[#allocation6 + $0x18] sm:$0xf0] }
 0x16e   : > { %v1058_v24 = vpop.f32.mrf.mxu2 }
 0x16f   : > { %v1117_v29 = vpop.f32.mrf.mxu3  ;;  %v4920_v22 = vadd.f32 %v1058_v24, %v1000_v19  ;;  %v1169_v18 = vpop.f32.mrf.mxu0  ;;  %v3383_v24 = vld [vmem:[%s4581_s30 + $0x90] sm:$0xf] }
 0x170   : > { %v1002_v47 = vpop.f32.mrf.mxu1  ;;  %v4927_v40 = vadd.f32 %v1169_v18, %v4876_v27  ;;  %v3367_v18 = vld [vmem:[%s4581_s30 + $0x68] sm:$0xf] }
 0x171   : > { %5391 = vst [vmem:[#allocation20_spill] sm:$0xff] %v4920_v22  ;;  %v1003_v26 = vadd.f32 %v1002_v47, %v4726_v49  ;;  %v3904_v49 = vld [vmem:[%s4581_s30 + $0x70] sm:$0xf0]  ;;  %v3909_v47 = vld [vmem:[%s4581_s30 + $0x98] sm:$0xf0] }
 0x172   : > { %1227 = vmatmul.bf16.gmra.mxu1 %v4685_v0  ;;  %1794 = vmatmul.bf16.gmra.mxu0 %v4918_v51  ;;  %v4949_v53 = vor.u32 %v3909_v47, %v3383_v24  ;;  %v3379_v47 = vld [vmem:[%s4581_s30 + $0x80] sm:$0xf] }
 0x173   : > { %1686 = vmatmul.bf16.gmra.mxu2 %v4922_v32  ;;  %v3385_v32 = vld [vmem:[%s4581_s30 + $0x9c] sm:$0xf0] }
 0x174   : > { %1745 = vmatmul.bf16.gmra.mxu3 %v4924_v21  ;;  %v3908_v21 = vld [vmem:[%s4581_s30 + $0x94] sm:$0xf]  ;;  %5396 = vst [vmem:[#allocation25_spill] sm:$0xff] %v4949_v53 }
 0x175   : > { %v4951_v58 = vor.u32 %v3908_v21, %v3385_v32 }
 0x176   : > { %v1061_v19 = vpop.f32.mrf.mxu2 }
 0x177   : > { %v1120_v13 = vpop.f32.mrf.mxu3  ;;  %v4934_v14 = vadd.f32 %v1061_v19, %v1003_v26  ;;  %v1171_v0 = vpop.f32.mrf.mxu0  ;;  %5397 = vst [vmem:[#allocation26_spill] sm:$0xff] %v4951_v58 }
 0x178   : > { %v1004_v27 = vpop.f32.mrf.mxu1  ;;  %v4936_v46 = vadd.f32 %v1171_v0, %v1112_v8  ;;  %v4945_v8 = vor.u32 %v3904_v49, %v3367_v18 }
 0x179   : > { %5394 = vst [vmem:[#allocation23_spill] sm:$0xff] %v4934_v14  ;;  %v1005_v26 = vadd.f32 %v1004_v27, %v4736_v59  ;;  %v3444_v59 = vor.u32 %v3922_v54, %v3441_v42  ;;  %v3397_v54 = vld [vmem:[%s4581_s30 + $0xb4] sm:$0xf0] }
 0x17b   : > { %1836 = vmatpush.bf16.msrb.mxu1 %v3444_v59 }
 0x17e   : > { %v1063_v19 = vpop.f32.mrf.mxu2 }
 0x17f   : > { %v1122_v14 = vpop.f32.mrf.mxu3  ;;  %v4947_v0 = vadd.f32 %v1063_v19, %v1005_v26  ;;  %v1174_v57 = vpop.f32.mrf.mxu0  ;;  %v3907_v26 = vld [vmem:[%s4581_s30 + $0x88] sm:$0xf0]  ;;  %v3912_v19 = vld [vmem:[%s4581_s30 + $0xb0] sm:$0xf0] }
 0x180   : > { %v1007_v22 = vpop.f32.mrf.mxu1  ;;  %v4954_v61 = vadd.f32 %v1174_v57, %v4905_v11  ;;  %v3911_v57 = vld [vmem:[%s4581_s30 + $0xac] sm:$0xf] }
 0x181   : > { %5395 = vst [vmem:[#allocation24_spill] sm:$0xff] %v4947_v0  ;;  %v1008_v32 = vadd.f32 %v1007_v22, %v4701_v36  ;;  %v4974_v36 = vor.u32 %v3907_v26, %v3379_v47  ;;  %v3497_v0 = vld [vmem:[#allocation6 + $0x88] sm:$0xf0] }
 0x182   : > { %1232 = vmatmul.bf16.gmra.mxu1 %v4695_v16  ;;  %1799 = vmatmul.bf16.gmra.mxu0 %v4945_v8  ;;  %v3395_v16 = vld [vmem:[%s4581_s30 + $0xa8] sm:$0xf] }
 0x183   : > { %1691 = vmatmul.bf16.gmra.mxu2 %v4949_v53  ;;  %v3936_v53 = vld [vmem:[#allocation6 + $0x84] sm:$0xf] }
 0x184   : > { %1750 = vmatmul.bf16.gmra.mxu3 %v4951_v58 }
 0x186   : > { %v1066_v21 = vpop.f32.mrf.mxu2 }
 0x187   : > { %v1125_v27 = vpop.f32.mrf.mxu3  ;;  %v4961_v11 = vadd.f32 %v1066_v21, %v1008_v32  ;;  %v1176_v18 = vpop.f32.mrf.mxu0 }
 0x188   : > { %v1009_v24 = vpop.f32.mrf.mxu1  ;;  %v4963_v49 = vadd.f32 %v1176_v18, %v1117_v29  ;;  %v4980_v29 = vor.u32 %v3911_v57, %v3397_v54  ;;  %v3407_v57 = vld [vmem:[%s4581_s30 + $0xc0] sm:$0xf]  ;;  %v3391_v54 = vld [vmem:[%s4581_s30 + $0x98] sm:$0xf] }
 0x189   : > { %5398 = vst [vmem:[#allocation27_spill] sm:$0xff] %v4961_v11  ;;  %v1010_v42 = vadd.f32 %v1009_v24, %v4713_v28  ;;  %v4978_v11 = vor.u32 %v3912_v19, %v3395_v16  ;;  %v3500_v28 = vor.u32 %v3936_v53, %v3497_v0  ;;  %v3561_v24 = vld [vmem:[#allocation6 + $0x108] sm:$0xf0] }
 0x18a   : > { %5399 = vst [vmem:[#allocation28_spill] sm:$0xff] %v4963_v49  ;;  %v3952_v49 = vld [vmem:[#allocation6 + $0x104] sm:$0xf]  ;;  %v3433_v16 = vld [vmem:[#allocation6 + $0x8] sm:$0xf0] }
 0x18b   : > { %5401 = vst [vmem:[#allocation30_spill] sm:$0xff] %v4980_v29  ;;  %1896 = vmatpush.bf16.msrb.mxu2 %v3500_v28 }
 0x18e   : > { %v1068_v58 = vpop.f32.mrf.mxu2 }
 0x18f   : > { %v4972_v59 = vpop.f32.mrf.mxu3  ;;  %v4976_v22 = vadd.f32 %v1068_v58, %v1010_v42  ;;  %v1179_v21 = vpop.f32.mrf.mxu0  ;;  %v3564_v58 = vor.u32 %v3952_v49, %v3561_v24  ;;  %v3910_v42 = vld [vmem:[%s4581_s30 + $0xa0] sm:$0xf0]  ;;  %v3409_v49 = vld [vmem:[%s4581_s30 + $0xcc] sm:$0xf0] }
 0x190   : > { %5400 = vst [vmem:[#allocation29_spill] sm:$0xff] %v4972_v59  ;;  %v1012_v32 = vpop.f32.mrf.mxu1  ;;  %v4982_v18 = vadd.f32 %v1179_v21, %v1120_v13  ;;  %v3920_v13 = vld [vmem:[#allocation6 + $0x4] sm:$0xf]  ;;  %v3914_v21 = vld [vmem:[%s4581_s30 + $0xc4] sm:$0xf] }
 0x191   : > { %v3436_v47 = vor.u32 %v3920_v13, %v3433_v16  ;;  %1955 = vmatpush.bf16.msrb.mxu3 %v3564_v58  ;;  %v3915_v32 = vld [vmem:[%s4581_s30 + $0xc8] sm:$0xf0]  ;;  %v5000_v16 = vor.u32 %v3914_v21, %v3409_v49  ;;  %v3421_v21 = vld [vmem:[%s4581_s30 + $0xe4] sm:$0xf0] }
 0x192   : > { %1237 = vmatmul.bf16.gmra.mxu1 %v4721_v31  ;;  %1804 = vmatmul.bf16.gmra.mxu0 %v4974_v36  ;;  %v4998_v58 = vor.u32 %v3915_v32, %v3407_v57  ;;  %v3403_v57 = vld [vmem:[%s4581_s30 + $0xb0] sm:$0xf]  ;;  %v3917_v32 = vld [vmem:[%s4581_s30 + $0xdc] sm:$0xf] }
 0x193   : > { %1696 = vmatmul.bf16.gmra.mxu2 %v4978_v11  ;;  %1837 = vmatpush.bf16.msrb.mxu1 %v3436_v47 }
 0x194   : > { %1755 = vmatmul.bf16.gmra.mxu3 %v4980_v29  ;;  %v4996_v29 = vor.u32 %v3910_v42, %v3391_v54  ;;  %v3913_v54 = vld [vmem:[%s4581_s30 + $0xb8] sm:$0xf0]  ;;  %v3918_v42 = vld [vmem:[%s4581_s30 + $0xe0] sm:$0xf0] }
 0x196   : > { %v1071_v31 = vpop.f32.mrf.mxu2 }
 0x197   : > { %v1130_v26 = vpop.f32.mrf.mxu3  ;;  %v1181_v53 = vpop.f32.mrf.mxu0 }
 0x198   : > { %v1014_v0 = vpop.f32.mrf.mxu1  ;;  %v4988_v19 = vadd.f32 %v1181_v53, %v1122_v14 }
 0x19e   : > { %v1073_v24 = vpop.f32.mrf.mxu2 }
 0x19f   : > { %v1132_v59 = vpop.f32.mrf.mxu3  ;;  %v1184_v28 = vpop.f32.mrf.mxu0 }
 0x1a0   : > { %v1203_v13 = vpop.f32.mrf.mxu1  ;;  %v5002_v14 = vadd.f32 %v1184_v28, %v1125_v27  ;;  %v5025_v28 = vor.u32 %v3913_v54, %v3403_v57 }
 0x1a1   : > { %v5005_v47 = vadd.f32 %v1203_v13, %v4792_v4 }
 0x1a2   : > { %1242 = vmatmul.bf16.gmra.mxu1 %v4742_v63  ;;  %1809 = vmatmul.bf16.gmra.mxu0 %v4996_v29  ;;  %v3419_v63 = vld [vmem:[%s4581_s30 + $0xd8] sm:$0xf] }
 0x1a3   : > { %1701 = vmatmul.bf16.gmra.mxu2 %v4998_v58 }
 0x1a4   : > { %1760 = vmatmul.bf16.gmra.mxu3 %v5000_v16 }
 0x1a6   : > { %v1662_v59 = vpop.f32.mrf.mxu2 }
 0x1a7   : > { %v1721_v31 = vpop.f32.mrf.mxu3  ;;  %v1663_v26 = vadd.f32 %v1662_v59, %v4749_v15  ;;  %v5012_v27 = vpop.f32.mrf.mxu0 }
 0x1a8   : > { %5402 = vst [vmem:[#allocation31_spill] sm:$0xff] %v5012_v27  ;;  %v1205_v0 = vpop.f32.mrf.mxu1  ;;  %v5028_v27 = vor.u32 %v3918_v42, %v3419_v63 }
 0x1a9   : > { %v5015_v4 = vadd.f32 %v1205_v0, %v4802_v60  ;;  %v5017_v53 = vadd.f32 %v1721_v31, %v1663_v26  ;;  %v5030_v60 = vor.u32 %v3917_v32, %v3421_v21  ;;  %v3415_v32 = vld [vmem:[%s4581_s30 + $0xc8] sm:$0xf] }
 0x1ae   : > { %v1664_v49 = vpop.f32.mrf.mxu2 }
 0x1af   : > { %v1723_v24 = vpop.f32.mrf.mxu3  ;;  %v1665_v15 = vadd.f32 %v1664_v49, %v4762_v20  ;;  %v1189_v13 = vpop.f32.mrf.mxu0  ;;  %v4087_v20 = vld [vmem:[#allocation8 + $0xb8] sm:$0xff] }
 0x1b0   : > { %v1208_v59 = vpop.f32.mrf.mxu1  ;;  %2392 = vmatpush.bf16.msrb.mxu0 %v4087_v20 }
 0x1b1   : > { %v5033_v31 = vadd.f32 %v1208_v59, %v4816_v45  ;;  %v5035_v26 = vadd.f32 %v1723_v24, %v1665_v15 }
 0x1b2   : > { %1247 = vmatmul.bf16.gmra.mxu1 %v4766_v62  ;;  %1814 = vmatmul.bf16.gmra.mxu0 %v5025_v28  ;;  %v3916_v62 = vld [vmem:[%s4581_s30 + $0xd0] sm:$0xf0] }
 0x1b3   : > { %1706 = vmatmul.bf16.gmra.mxu2 %v5028_v27  ;;  %v5049_v24 = vor.u32 %v3916_v62, %v3415_v32  ;;  %v3919_v32 = vld [vmem:[%s4581_s30 + $0xe8] sm:$0xf0] }
 0x1b4   : > { %1765 = vmatmul.bf16.gmra.mxu3 %v5030_v60 }
 0x1b6   : > { %v1667_v0 = vpop.f32.mrf.mxu2 }
 0x1b7   : > { %v1726_v63 = vpop.f32.mrf.mxu3  ;;  %v1668_v57 = vadd.f32 %v1667_v0, %v4775_v30 }
 0x1b8   : > { %v1210_v54 = vpop.f32.mrf.mxu1 }
 0x1b9   : > { %v5043_v45 = vadd.f32 %v1210_v54, %v4825_v5  ;;  %v5045_v42 = vadd.f32 %v1726_v63, %v1668_v57  ;;  %v4086_v57 = vld [vmem:[#allocation8 + $0xb0] sm:$0xff] }
 0x1ba   : > { %v3427_v54 = vld [vmem:[%s4581_s30 + $0xe0] sm:$0xf]  ;;  %2393 = vmatpush.bf16.msrb.mxu0 %v4086_v57 }
 0x1be   : > { %v1669_v21 = vpop.f32.mrf.mxu2 }
 0x1bf   : > { %v1728_v49 = vpop.f32.mrf.mxu3  ;;  %v1670_v15 = vadd.f32 %v1669_v21, %v4784_v43  ;;  %v5069_v21 = vor.u32 %v3919_v32, %v3427_v54 }
 0x1c0   : > { %v1213_v13 = vpop.f32.mrf.mxu1 }
 0x1c1   : > { %v5053_v59 = vadd.f32 %v1213_v13, %v4843_v25  ;;  %v5055_v30 = vadd.f32 %v1728_v49, %v1670_v15 }
 0x1c2   : > { %1819 = vmatmul.bf16.gmra.mxu0 %v5049_v24  ;;  %1838 = vmatmul.bf16.vlgmr.msrb.gmra.mxu1 %v4786_v1 }
 0x1c3   : > { %1897 = vmatmul.bf16.vlgmr.msrb.gmra.mxu2 %v4788_v2 }
 0x1c4   : > { %1956 = vmatmul.bf16.vlgmr.msrb.gmra.mxu3 %v4835_v44 }
 0x1c6   : > { %v1672_v5 = vpop.f32.mrf.mxu2 }
 0x1c7   : > { %v1731_v20 = vpop.f32.mrf.mxu3  ;;  %v1673_v0 = vadd.f32 %v1672_v5, %v4798_v10 }
 0x1c8   : > { %v1215_v43 = vpop.f32.mrf.mxu1 }
 0x1c9   : > { %v5063_v63 = vadd.f32 %v1215_v43, %v4852_v56  ;;  %v5065_v25 = vadd.f32 %v1731_v20, %v1673_v0  ;;  %v4085_v20 = vld [vmem:[#allocation8 + $0xa8] sm:$0xff] }
 0x1ca   : > { %2394 = vmatpush.bf16.msrb.mxu0 %v4085_v20  ;;  %v5403_v20 = vld [vmem:[#allocation16_spill] sm:$0xff] }
 0x1ce   : > { %v1674_v62 = vpop.f32.mrf.mxu2 }
 0x1cf   : > { %v1733_v1 = vpop.f32.mrf.mxu3  ;;  %v1675_v2 = vadd.f32 %v1674_v62, %v4808_v34 }
 0x1d0   : > { %v1218_v44 = vpop.f32.mrf.mxu1 }
 0x1d1   : > { %v5073_v49 = vadd.f32 %v1218_v44, %v4869_v39  ;;  %v5075_v10 = vadd.f32 %v1733_v1, %v1675_v2 }
 0x1d2   : > { %1824 = vmatmul.bf16.gmra.mxu0 %v5069_v21  ;;  %1843 = vmatmul.bf16.gmra.mxu1 %v4810_v55 }
 0x1d3   : > { %1902 = vmatmul.bf16.gmra.mxu2 %v4812_v38 }
 0x1d4   : > { %1961 = vmatmul.bf16.gmra.mxu3 %v4861_v37 }
 0x1d6   : > { %v1677_v56 = vpop.f32.mrf.mxu2 }
 0x1d7   : > { %v1736_v15 = vpop.f32.mrf.mxu3  ;;  %v1678_v13 = vadd.f32 %v1677_v56, %v4822_v41 }
 0x1d8   : > { %v1220_v5 = vpop.f32.mrf.mxu1 }
 0x1d9   : > { %v5083_v34 = vadd.f32 %v1220_v5, %v4881_v50  ;;  %v5085_v39 = vadd.f32 %v1736_v15, %v1678_v13 }
 0x1de   : > { %v1679_v0 = vpop.f32.mrf.mxu2 }
 0x1df   : > { %v1738_v43 = vpop.f32.mrf.mxu3  ;;  %v1680_v55 = vadd.f32 %v1679_v0, %v4837_v12 }
 0x1e0   : > { %v1223_v57 = vpop.f32.mrf.mxu1 }
 0x1e1   : > { %v5089_v38 = vadd.f32 %v1223_v57, %v4898_v7  ;;  %v5091_v37 = vadd.f32 %v1738_v43, %v1680_v55  ;;  %v5404_v43 = vld [vmem:[#allocation17_spill] sm:$0xff]  ;;  %v5405_v55 = vld [vmem:[#allocation18_spill] sm:$0xff] }
 0x1e2   : > { %1848 = vmatmul.bf16.gmra.mxu1 %v4839_v23 }
 0x1e3   : > { %1907 = vmatmul.bf16.gmra.mxu2 %v4841_v9 }
 0x1e4   : > { %1966 = vmatmul.bf16.gmra.mxu3 %v4890_v48  ;;  %v4084_v48 = vld [vmem:[#allocation8 + $0xa0] sm:$0xff] }
 0x1e5   : > { %2395 = vmatpush.bf16.msrb.mxu0 %v4084_v48 }
 0x1e6   : > { %v1682_v41 = vpop.f32.mrf.mxu2 }
 0x1e7   : > { %v1741_v50 = vpop.f32.mrf.mxu3  ;;  %v1683_v54 = vadd.f32 %v1682_v41, %v4850_v6  ;;  %v5406_v41 = vld [vmem:[#allocation19_spill] sm:$0xff] }
 0x1e8   : > { %v1225_v32 = vpop.f32.mrf.mxu1 }
 0x1e9   : > { %v5098_v62 = vadd.f32 %v1225_v32, %v4909_v52  ;;  %v5100_v12 = vadd.f32 %v1741_v50, %v1683_v54  ;;  %v5407_v32 = vld [vmem:[#allocation28_spill] sm:$0xff] }
 0x1ee   : > { %v1684_v7 = vpop.f32.mrf.mxu2 }
 0x1ef   : > { %v1743_v1 = vpop.f32.mrf.mxu3  ;;  %v1685_v2 = vadd.f32 %v1684_v7, %v4863_v17 }
 0x1f0   : > { %v1228_v44 = vpop.f32.mrf.mxu1 }
 0x1f1   : > { %v5104_v23 = vadd.f32 %v1228_v44, %v4927_v40  ;;  %v5106_v9 = vadd.f32 %v1743_v1, %v1685_v2  ;;  %v5408_v44 = vld [vmem:[#allocation20_spill] sm:$0xff] }
 0x1f2   : > { %1853 = vmatmul.bf16.gmra.mxu1 %v4865_v35 }
 0x1f3   : > { %1912 = vmatmul.bf16.gmra.mxu2 %v4867_v33 }
 0x1f4   : > { %1971 = vmatmul.bf16.gmra.mxu3 %v4918_v51 }
 0x1f6   : > { %v1687_v6 = vpop.f32.mrf.mxu2 }
 0x1f7   : > { %v1746_v52 = vpop.f32.mrf.mxu3  ;;  %v1688_v56 = vadd.f32 %v1687_v6, %v4878_v3  ;;  %v4083_v3 = vld [vmem:[#allocation8 + $0x98] sm:$0xff] }
 0x1f8   : > { %v1230_v15 = vpop.f32.mrf.mxu1  ;;  %2396 = vmatpush.bf16.msrb.mxu0 %v4083_v3 }
 0x1f9   : > { %v5113_v17 = vadd.f32 %v1230_v15, %v4936_v46  ;;  %v5115_v40 = vadd.f32 %v1746_v52, %v1688_v56  ;;  %v5409_v15 = vld [vmem:[#allocation21_spill] sm:$0xff] }
 0x1fe   : > { %v1689_v13 = vpop.f32.mrf.mxu2 }
 0x1ff   : > { %v1748_v5 = vpop.f32.mrf.mxu3  ;;  %v1690_v0 = vadd.f32 %v1689_v13, %v5403_v20  ;;  %v5410_v13 = vld [vmem:[#allocation22_spill] sm:$0xff] }
 0x200   : > { %v1233_v35 = vpop.f32.mrf.mxu1 }
 0x201   : > { %v5119_v33 = vadd.f32 %v1233_v35, %v4954_v61  ;;  %v5121_v51 = vadd.f32 %v1748_v5, %v1690_v0  ;;  %v5411_v0 = vld [vmem:[#allocation23_spill] sm:$0xff] }
 0x202   : > { %1858 = vmatmul.bf16.gmra.mxu1 %v5404_v43 }
 0x203   : > { %1917 = vmatmul.bf16.gmra.mxu2 %v5405_v55 }
 0x204   : > { %1976 = vmatmul.bf16.gmra.mxu3 %v4945_v8  ;;  %v1191_v8 = vpop.f32.mrf.mxu0 }
 0x206   : > { %v1692_v46 = vpop.f32.mrf.mxu2 }
 0x207   : > { %v1751_v57 = vpop.f32.mrf.mxu3  ;;  %v1693_v50 = vadd.f32 %v1692_v46, %v5406_v41 }
 0x208   : > { %v1235_v54 = vpop.f32.mrf.mxu1 }
 0x209   : > { %v5128_v7 = vadd.f32 %v1235_v54, %v5407_v32  ;;  %v5130_v61 = vadd.f32 %v1751_v57, %v1693_v50  ;;  %v5412_v50 = vld [vmem:[#allocation24_spill] sm:$0xff] }
 0x20c   : > { %v5147_v46 = vpop.f32.mrf.mxu0 }
 0x20e   : > { %v1694_v1 = vpop.f32.mrf.mxu2 }
 0x20f   : > { %v1753_v2 = vpop.f32.mrf.mxu3  ;;  %v1695_v48 = vadd.f32 %v1694_v1, %v5408_v44  ;;  %v4077_v44 = vld [vmem:[#allocation8 + $0x78] sm:$0xff] }
 0x210   : > { %v1238_v6 = vpop.f32.mrf.mxu1  ;;  %2621 = vmatpush.bf16.msra.mxu3 %v4077_v44  ;;  %v4081_v44 = vld [vmem:[#allocation8 + $0x88] sm:$0xff] }
 0x211   : > { %v5134_v52 = vadd.f32 %v1238_v6, %v4982_v18  ;;  %v5136_v56 = vadd.f32 %v1753_v2, %v1695_v48  ;;  %v4082_v18 = vld [vmem:[#allocation8 + $0x90] sm:$0xff]  ;;  %v5413_v2 = vld [vmem:[#allocation25_spill] sm:$0xff] }
 0x212   : > { %1863 = vmatmul.bf16.gmra.mxu1 %v5409_v15  ;;  %2397 = vmatpush.bf16.msrb.mxu0 %v4082_v18  ;;  %v5414_v48 = vld [vmem:[#allocation26_spill] sm:$0xff]  ;;  %v4075_v18 = vld [vmem:[#allocation8 + $0x68] sm:$0xff] }
 0x213   : > { %1922 = vmatmul.bf16.gmra.mxu2 %v5410_v13  ;;  %v4068_v13 = vld [vmem:[#allocation8 + $0x30] sm:$0xff] }
 0x214   : > { %1981 = vmatmul.bf16.gmra.mxu3 %v4974_v36  ;;  %v5158_v6 = vpop.f32.mrf.mxu0 }
 0x216   : > { %v1697_v5 = vpop.f32.mrf.mxu2  ;;  %2398 = vmatpush.bf16.msrb.mxu0 %v4081_v44  ;;  %v4070_v44 = vld [vmem:[#allocation8 + $0x40] sm:$0xff] }
 0x217   : > { %v1756_v20 = vpop.f32.mrf.mxu3  ;;  %v1698_v35 = vadd.f32 %v1697_v5, %v5411_v0  ;;  %v4076_v5 = vld [vmem:[#allocation8 + $0x70] sm:$0xff] }
 0x218   : > { %v1240_v43 = vpop.f32.mrf.mxu1  ;;  %2622 = vmatpush.bf16.msra.mxu3 %v4076_v5 }
 0x219   : > { %v5143_v55 = vadd.f32 %v1240_v43, %v4988_v19  ;;  %v5145_v3 = vadd.f32 %v1756_v20, %v1698_v35  ;;  %v4069_v19 = vld [vmem:[#allocation8 + $0x38] sm:$0xff]  ;;  %v4067_v43 = vld [vmem:[#allocation8 + $0x28] sm:$0xff] }
 0x21a   : > { %2580 = vmatpush.bf16.msra.mxu2 %v4069_v19 }
 0x21c   : > { %2623 = vmatpush.bf16.msra.mxu3 %v4075_v18 }
 0x21e   : > { %v1699_v57 = vpop.f32.mrf.mxu2  ;;  %2581 = vmatpush.bf16.msra.mxu2 %v4068_v13  ;;  %v5416_v13 = vld [vmem:[#allocation30_spill] sm:$0xff] }
 0x21f   : > { %v1758_v41 = vpop.f32.mrf.mxu3  ;;  %v1700_v54 = vadd.f32 %v1699_v57, %v5412_v50  ;;  %v4074_v50 = vld [vmem:[#allocation8 + $0x60] sm:$0xff] }
 0x220   : > { %v1243_v32 = vpop.f32.mrf.mxu1  ;;  %2624 = vmatpush.bf16.msra.mxu3 %v4074_v50 }
 0x221   : > { %v5151_v36 = vadd.f32 %v1243_v32, %v5002_v14  ;;  %v5153_v1 = vadd.f32 %v1758_v41, %v1700_v54  ;;  %v5415_v14 = vld [vmem:[#allocation27_spill] sm:$0xff]  ;;  %v4066_v41 = vld [vmem:[#allocation8 + $0x20] sm:$0xff]  ;;  %v5165_v54 = vpop.f32.mrf.mxu0 }
 0x222   : > { %1868 = vmatmul.bf16.gmra.mxu1 %v5413_v2  ;;  %2582 = vmatpush.bf16.msra.mxu2 %v4067_v43  ;;  %v4072_v43 = vld [vmem:[#allocation8 + $0x50] sm:$0xff] }
 0x223   : > { %1927 = vmatmul.bf16.gmra.mxu2 %v5414_v48  ;;  %v4095_v48 = vld [vmem:[#allocation8 + $0xf8] sm:$0xff] }
 0x224   : > { %1986 = vmatmul.bf16.gmra.mxu3 %v4996_v29  ;;  %2433 = vmatpush.bf16.msra.mxu1 %v4095_v48 }
 0x226   : > { %v1702_v8 = vpop.f32.mrf.mxu2  ;;  %2583 = vmatpush.bf16.msra.mxu2 %v4066_v41  ;;  %v4071_v41 = vld [vmem:[#allocation8 + $0x48] sm:$0xff] }
 0x227   : > { %v1761_v15 = vpop.f32.mrf.mxu3  ;;  %v1703_v20 = vadd.f32 %v1702_v8, %v5415_v14  ;;  %v4065_v8 = vld [vmem:[#allocation8 + $0x18] sm:$0xff]  ;;  %v4094_v14 = vld [vmem:[#allocation8 + $0xf0] sm:$0xff] }
 0x228   : > { %v5161_v0 = vpop.f32.mrf.mxu1  ;;  %2434 = vmatpush.bf16.msra.mxu1 %v4094_v14 }
 0x229   : > { %v5163_v35 = vadd.f32 %v1761_v15, %v1703_v20  ;;  %v4073_v15 = vld [vmem:[#allocation8 + $0x58] sm:$0xff]  ;;  %v4064_v20 = vld [vmem:[#allocation8 + $0x10] sm:$0xff] }
 0x22a   : > { %2584 = vmatpush.bf16.msra.mxu2 %v4065_v8  ;;  %2625 = vmatpush.bf16.msra.mxu3 %v4073_v15  ;;  %v2007_v8 = vld [vmem:[%s5367_s4] sm:$0x3]  ;;  %v4091_v15 = vld [vmem:[#allocation8 + $0xd8] sm:$0xff] }
 0x22e   : > { %v1704_v29 = vpop.f32.mrf.mxu2  ;;  %2585 = vmatpush.bf16.msra.mxu2 %v4064_v20  ;;  %2626 = vmatpush.bf16.msra.mxu3 %v4072_v43 }
 0x22f   : > { %v1763_v57 = vpop.f32.mrf.mxu3  ;;  %v1705_v32 = vadd.f32 %v1704_v29, %v4976_v22  ;;  %v5173_v29 = vpop.f32.mrf.mxu0 }
 0x230   : > { %v1248_v2 = vpop.f32.mrf.mxu1 }
 0x231   : > { %v5168_v19 = vadd.f32 %v1763_v57, %v1705_v32  ;;  %v4063_v57 = vld [vmem:[#allocation8 + $0x8] sm:$0xff]  ;;  %v4092_v32 = vld [vmem:[#allocation8 + $0xe0] sm:$0xff] }
 0x232   : > { %1873 = vmatmul.bf16.gmra.mxu1 %v4978_v11  ;;  %v4093_v11 = vld [vmem:[#allocation8 + $0xe8] sm:$0xff]  ;;  %2586 = vmatpush.bf16.msra.mxu2 %v4063_v57  ;;  %v4062_v2 = vld [vmem:[#allocation8] sm:$0xff] }
 0x233   : > { %1932 = vmatmul.bf16.gmra.mxu2 %v5416_v13  ;;  %2435 = vmatpush.bf16.msra.mxu1 %v4093_v11 }
 0x234   : > { %1991 = vmatmul.bf16.gmra.mxu3 %v5025_v28 }
 0x235   : > { %2627 = vmatpush.bf16.msra.mxu3 %v4071_v41 }
 0x236   : > { %v1707_v22 = vpop.f32.mrf.mxu2  ;;  %2587 = vmatpush.bf16.msra.mxu2 %v4062_v2 }
 0x237   : > { %v1766_v5 = vpop.f32.mrf.mxu3  ;;  %2436 = vmatpush.bf16.msra.mxu1 %v4092_v32  ;;  %v5179_v13 = vpop.f32.mrf.mxu0  ;;  %v1781_v22 = vadd.f32 %v5147_v46, %v5017_v53 }
 0x238   : > { %v1250_v18 = vpop.f32.mrf.mxu1  ;;  %v5185_v5 = vperm.slane %v2007_v8, 0 }
 0x239   : > { %2628 = vmatpush.bf16.msra.mxu3 %v4070_v44  ;;  %v4090_v18 = vld [vmem:[#allocation8 + $0xd0] sm:$0xff] }
 0x23b   : > { %2437 = vmatpush.bf16.msra.mxu1 %v4091_v15 }
 0x23e   : > { %v1709_v28 = vpop.f32.mrf.mxu2 }
 0x23f   : > { %v1768_v50 = vpop.f32.mrf.mxu3  ;;  %2438 = vmatpush.bf16.msra.mxu1 %v4090_v18  ;;  %v4089_v28 = vld [vmem:[#allocation8 + $0xc8] sm:$0xff]  ;;  %v5194_v46 = vpop.f32.mrf.mxu0 }
 0x240   : > { %v1839_v48 = vpop.f32.mrf.mxu1 }
 0x241   : > { %v1840_v14 = vadd.f32 %v1839_v48, %v5005_v47  ;;  %v1783_v47 = vadd.f32 %v5158_v6, %v5035_v26  ;;  %v1786_v6 = vadd.f32 %v5165_v54, %v5045_v42  ;;  %v1788_v42 = vadd.f32 %v5173_v29, %v5055_v30 }
 0x242   : > { %1878 = vmatmul.bf16.gmra.mxu1 %v4998_v58  ;;  %v5188_v58 = vperm.slane %v2007_v8, 1  ;;  %v4088_v8 = vld [vmem:[#allocation8 + $0xc0] sm:$0xff] }
 0x243   : > { %1937 = vmatmul.bf16.gmra.mxu2 %v5000_v16  ;;  %v2013_v16 = vadd.f32 %v5185_v5, %v1781_v22  ;;  %2439 = vmatpush.bf16.msra.mxu1 %v4089_v28 }
 0x244   : > { %1996 = vmatmul.bf16.gmra.mxu3 %v5049_v24  ;;  %v4080_v24 = vld [vmem:[#allocation8 + $0x80] sm:$0xff] }
 0x245   : > { %2399 = vmatpush.bf16.msrb.mxu0 %v4080_v24  ;;  %v2053_v53 = vmax.f32 %v2013_v16, 0.0 }
 0x246   : > { %v1898_v20 = vpop.f32.mrf.mxu2 }
 0x247   : > { %v1957_v43 = vpop.f32.mrf.mxu3  ;;  %v1899_v11 = vadd.f32 %v1898_v20, %v1840_v14  ;;  %2440 = vmatpush.bf16.msra.mxu1 %v4088_v8  ;;  %v2015_v20 = vadd.f32 %v5185_v5, %v1783_v47 }
 0x248   : > { %v1841_v57 = vpop.f32.mrf.mxu1 }
 0x249   : > { %v1958_v41 = vadd.f32 %v1957_v43, %v1899_v11  ;;  %v1842_v2 = vadd.f32 %v1841_v57, %v5015_v4  ;;  %v2055_v4 = vmax.f32 %v2015_v20, 0.0 }
 0x24b   : > { %v2014_v50 = vadd.f32 %v5188_v58, %v1958_v41  ;;  %v5205_v41 = vpop.f32.mrf.mxu0 }
 0x24d   : > { %v2054_v32 = vmax.f32 %v2014_v50, 0.0  ;;  %v2017_v50 = vadd.f32 %v5185_v5, %v1786_v6 }
 0x24e   : > { %v1900_v44 = vpop.f32.mrf.mxu2 }
 0x24f   : > { %v1959_v48 = vpop.f32.mrf.mxu3  ;;  %v2093_v15 = vpack.c.bf16 %v2054_v32, %v2053_v53  ;;  %v1901_v22 = vadd.f32 %v1900_v44, %v1842_v2  ;;  %v4111_v53 = vld [vmem:[#allocation9 + $0x38] sm:$0xff]  ;;  %v2057_v47 = vmax.f32 %v2017_v50, 0.0 }
 0x250   : > { %v1844_v14 = vpop.f32.mrf.mxu1  ;;  %2790 = vmatpush.bf16.msra.mxu0 %v4111_v53 }
 0x251   : > { %2113 = vst [vmem:[#allocation2] sm:$0xff] %v2093_v15  ;;  %v1960_v43 = vadd.f32 %v1959_v48, %v1901_v22  ;;  %v1845_v11 = vadd.f32 %v1844_v14, %v5033_v31 }
 0x252   : > { %1883 = vmatmul.bf16.gmra.mxu1 %v5028_v27 }
 0x253   : > { %v2016_v26 = vadd.f32 %v5188_v58, %v1960_v43  ;;  %1942 = vmatmul.bf16.gmra.mxu2 %v5030_v60  ;;  %v2019_v43 = vadd.f32 %v5185_v5, %v1788_v42 }
 0x254   : > { %2001 = vmatmul.bf16.gmra.mxu3 %v5069_v21 }
 0x255   : > { %v2056_v18 = vmax.f32 %v2016_v26, 0.0  ;;  %v5213_v26 = vpop.f32.mrf.mxu0 }
 0x256   : > { %v1903_v57 = vpop.f32.mrf.mxu2 }
 0x257   : > { %v1962_v16 = vpop.f32.mrf.mxu3  ;;  %v2094_v24 = vpack.c.bf16 %v2056_v18, %v2055_v4  ;;  %v1904_v28 = vadd.f32 %v1903_v57, %v1845_v11  ;;  %v1791_v18 = vadd.f32 %v5179_v13, %v5065_v25  ;;  %v1793_v25 = vadd.f32 %v5194_v46, %v5075_v10 }
 0x258   : > { %v1846_v27 = vpop.f32.mrf.mxu1  ;;  %v3751_v15 = vld [vmem:[#allocation2] sm:$0xf]  ;;  %v4046_v14 = vld [vmem:[#allocation2 + $0x4] sm:$0xf]  ;;  %v1796_v46 = vadd.f32 %v5205_v41, %v5085_v39  ;;  %v1798_v39 = vadd.f32 %v5213_v26, %v5091_v37 }
 0x259   : > { %2114 = vst [vmem:[#allocation2 + $0x8] sm:$0xff] %v2094_v24  ;;  %v1963_v60 = vadd.f32 %v1962_v16, %v1904_v28  ;;  %v1847_v54 = vadd.f32 %v1846_v27, %v5043_v45  ;;  %v2059_v45 = vmax.f32 %v2019_v43, 0.0 }
 0x25b   : > { %v2018_v21 = vadd.f32 %v5188_v58, %v1963_v60  ;;  %v2021_v60 = vadd.f32 %v5185_v5, %v1791_v18 }
 0x25d   : > { %v2058_v31 = vmax.f32 %v2018_v21, 0.0  ;;  %v4110_v21 = vld [vmem:[#allocation9 + $0x30] sm:$0xff] }
 0x25e   : > { %v1905_v32 = vpop.f32.mrf.mxu2  ;;  %2791 = vmatpush.bf16.msra.mxu0 %v4110_v21 }
 0x25f   : > { %v1964_v2 = vpop.f32.mrf.mxu3  ;;  %v2095_v44 = vpack.c.bf16 %v2058_v31, %v2057_v47  ;;  %v1906_v48 = vadd.f32 %v1905_v32, %v1847_v54  ;;  %v5220_v47 = vpop.f32.mrf.mxu0  ;;  %v2061_v31 = vmax.f32 %v2021_v60, 0.0 }
 0x260   : > { %v1849_v8 = vpop.f32.mrf.mxu1  ;;  %v4047_v22 = vld [vmem:[#allocation2 + $0x4] sm:$0xf0]  ;;  %v3753_v20 = vld [vmem:[#allocation2 + $0x8] sm:$0xf0]  ;;  %v1801_v26 = vadd.f32 %v5220_v47, %v5100_v12 }
 0x261   : > { %2115 = vst [vmem:[#allocation2 + $0x10] sm:$0xff] %v2095_v44  ;;  %v1965_v4 = vadd.f32 %v1964_v2, %v1906_v48  ;;  %v3752_v6 = vor.u32 %v4047_v22, %v3751_v15  ;;  %v3756_v30 = vor.u32 %v4046_v14, %v3753_v20  ;;  %v1850_v57 = vadd.f32 %v1849_v8, %v5053_v59 }
 0x262   : > { %v2023_v20 = vadd.f32 %v5185_v5, %v1793_v25 }
 0x263   : > { %v2020_v29 = vadd.f32 %v5188_v58, %v1965_v4  ;;  %2588 = vmatmul.bf16.vlgmr.msra.gmra.mxu2 %v3752_v6 }
 0x264   : > { %2629 = vmatmul.bf16.vlgmr.msra.gmra.mxu3 %v3756_v30 }
 0x265   : > { %v2060_v11 = vmax.f32 %v2020_v29, 0.0 }
 0x266   : > { %v1908_v16 = vpop.f32.mrf.mxu2 }
 0x267   : > { %v1967_v24 = vpop.f32.mrf.mxu3  ;;  %v2096_v28 = vpack.c.bf16 %v2060_v11, %v2059_v45  ;;  %v1909_v27 = vadd.f32 %v1908_v16, %v1850_v57  ;;  %v1802_v30 = vpop.f32.mrf.mxu0 }
 0x268   : > { %v1851_v50 = vpop.f32.mrf.mxu1  ;;  %v3623_v8 = vld [vmem:[#allocation2 + $0x10] sm:$0xf]  ;;  %v4048_v22 = vld [vmem:[#allocation2 + $0x14] sm:$0xf]  ;;  %v1803_v12 = vadd.f32 %v1802_v30, %v5106_v9 }
 0x269   : > { %2116 = vst [vmem:[#allocation2 + $0x18] sm:$0xff] %v2096_v28  ;;  %v1968_v53 = vadd.f32 %v1967_v24, %v1909_v27  ;;  %v1852_v13 = vadd.f32 %v1851_v50, %v5063_v63  ;;  %v2063_v63 = vmax.f32 %v2023_v20, 0.0  ;;  %v2025_v28 = vadd.f32 %v5185_v5, %v1796_v46  ;;  %v4109_v50 = vld [vmem:[#allocation9 + $0x28] sm:$0xff] }
 0x26a   : > { %2792 = vmatpush.bf16.msra.mxu0 %v4109_v50  ;;  %v2029_v46 = vadd.f32 %v5185_v5, %v1801_v26 }
 0x26b   : > { %v2022_v42 = vadd.f32 %v5188_v58, %v1968_v53  ;;  %v2065_v53 = vmax.f32 %v2025_v28, 0.0 }
 0x26d   : > { %v2062_v59 = vmax.f32 %v2022_v42, 0.0 }
 0x26e   : > { %v1910_v54 = vpop.f32.mrf.mxu2 }
 0x26f   : > { %v1969_v32 = vpop.f32.mrf.mxu3  ;;  %v2097_v2 = vpack.c.bf16 %v2062_v59, %v2061_v31  ;;  %v1911_v44 = vadd.f32 %v1910_v54, %v1852_v13  ;;  %v1805_v31 = vpop.f32.mrf.mxu0 }
 0x270   : > { %v1854_v48 = vpop.f32.mrf.mxu1  ;;  %v4049_v15 = vld [vmem:[#allocation2 + $0x14] sm:$0xf0]  ;;  %v3625_v14 = vld [vmem:[#allocation2 + $0x18] sm:$0xf0]  ;;  %v1806_v30 = vadd.f32 %v1805_v31, %v5115_v40 }
 0x271   : > { %2117 = vst [vmem:[#allocation2 + $0x20] sm:$0xff] %v2097_v2  ;;  %v1970_v43 = vadd.f32 %v1969_v32, %v1911_v44  ;;  %v3624_v4 = vor.u32 %v4049_v15, %v3623_v8  ;;  %v3628_v6 = vor.u32 %v4048_v22, %v3625_v14  ;;  %v1855_v45 = vadd.f32 %v1854_v48, %v5073_v49 }
 0x272   : > { %v2027_v48 = vadd.f32 %v5185_v5, %v1798_v39 }
 0x273   : > { %v2024_v10 = vadd.f32 %v5188_v58, %v1970_v43  ;;  %2400 = vmatmul.bf16.vlgmr.msrb.gmra.mxu0 %v3624_v4  ;;  %2441 = vmatmul.bf16.vlgmr.msra.gmra.mxu1 %v3628_v6 }
 0x274   : > { %2592 = vmatmul.bf16.gmra.mxu2 %v3624_v4  ;;  %2633 = vmatmul.bf16.gmra.mxu3 %v3628_v6 }
 0x275   : > { %v2064_v29 = vmax.f32 %v2024_v10, 0.0 }
 0x276   : > { %v1913_v18 = vpop.f32.mrf.mxu2 }
 0x277   : > { %v1972_v11 = vpop.f32.mrf.mxu3  ;;  %v2098_v57 = vpack.c.bf16 %v2064_v29, %v2063_v63  ;;  %v1914_v16 = vadd.f32 %v1913_v18, %v1855_v45  ;;  %v1807_v29 = vpop.f32.mrf.mxu0  ;;  %v4108_v18 = vld [vmem:[#allocation9 + $0x20] sm:$0xff] }
 0x278   : > { %v1856_v24 = vpop.f32.mrf.mxu1  ;;  %v3631_v54 = vld [vmem:[#allocation2 + $0x20] sm:$0xf]  ;;  %v4050_v2 = vld [vmem:[#allocation2 + $0x24] sm:$0xf]  ;;  %2793 = vmatpush.bf16.msra.mxu0 %v4108_v18 }
 0x279   : > { %2118 = vst [vmem:[#allocation2 + $0x28] sm:$0xff] %v2098_v57  ;;  %v1973_v27 = vadd.f32 %v1972_v11, %v1914_v16  ;;  %v1857_v49 = vadd.f32 %v1856_v24, %v5083_v34  ;;  %v2067_v34 = vmax.f32 %v2027_v48, 0.0  ;;  %v2069_v57 = vmax.f32 %v2029_v46, 0.0 }
 0x27b   : > { %v2026_v60 = vadd.f32 %v5188_v58, %v1973_v27 }
 0x27d   : > { %v2066_v41 = vmax.f32 %v2026_v60, 0.0 }
 0x27e   : > { %v1915_v21 = vpop.f32.mrf.mxu2 }
 0x27f   : > { %v1974_v42 = vpop.f32.mrf.mxu3  ;;  %v2099_v25 = vpack.c.bf16 %v2066_v41, %v2065_v53  ;;  %v1916_v59 = vadd.f32 %v1915_v21, %v1857_v49  ;;  %v2031_v49 = vadd.f32 %v5185_v5, %v1803_v12 }
 0x280   : > { %v1859_v13 = vpop.f32.mrf.mxu1  ;;  %v4051_v32 = vld [vmem:[#allocation2 + $0x24] sm:$0xf0]  ;;  %v3633_v44 = vld [vmem:[#allocation2 + $0x28] sm:$0xf0] }
 0x281   : > { %2119 = vst [vmem:[#allocation2 + $0x30] sm:$0xff] %v2099_v25  ;;  %v1975_v8 = vadd.f32 %v1974_v42, %v1916_v59  ;;  %v3632_v15 = vor.u32 %v4051_v32, %v3631_v54  ;;  %v3636_v22 = vor.u32 %v4050_v2, %v3633_v44  ;;  %v1860_v20 = vadd.f32 %v1859_v13, %v5089_v38  ;;  %v1810_v59 = vpop.f32.mrf.mxu0 }
 0x283   : > { %v2028_v37 = vadd.f32 %v5188_v58, %v1975_v8  ;;  %2404 = vmatmul.bf16.gmra.mxu0 %v3632_v15  ;;  %2445 = vmatmul.bf16.gmra.mxu1 %v3636_v22 }
 0x284   : > { %2596 = vmatmul.bf16.gmra.mxu2 %v3632_v15  ;;  %2637 = vmatmul.bf16.gmra.mxu3 %v3636_v22  ;;  %v2033_v15 = vadd.f32 %v5185_v5, %v1806_v30 }
 0x285   : > { %v2068_v14 = vmax.f32 %v2028_v37, 0.0  ;;  %v4107_v37 = vld [vmem:[#allocation9 + $0x18] sm:$0xff] }
 0x286   : > { %v1918_v43 = vpop.f32.mrf.mxu2  ;;  %2794 = vmatpush.bf16.msra.mxu0 %v4107_v37  ;;  %v2073_v26 = vmax.f32 %v2033_v15, 0.0 }
 0x287   : > { %v1977_v4 = vpop.f32.mrf.mxu3  ;;  %v2100_v6 = vpack.c.bf16 %v2068_v14, %v2067_v34  ;;  %v1919_v10 = vadd.f32 %v1918_v43, %v1860_v20  ;;  %v1808_v14 = vadd.f32 %v1807_v29, %v5121_v51  ;;  %v1811_v29 = vadd.f32 %v1810_v59, %v5130_v61 }
 0x288   : > { %v1861_v63 = vpop.f32.mrf.mxu1  ;;  %v3639_v60 = vld [vmem:[#allocation2 + $0x30] sm:$0xf]  ;;  %v4052_v39 = vld [vmem:[#allocation2 + $0x34] sm:$0xf] }
 0x289   : > { %2120 = vst [vmem:[#allocation2 + $0x38] sm:$0xff] %v2100_v6  ;;  %v1978_v45 = vadd.f32 %v1977_v4, %v1919_v10  ;;  %v1862_v38 = vadd.f32 %v1861_v63, %v5098_v62  ;;  %v2071_v62 = vmax.f32 %v2031_v49, 0.0  ;;  %v1812_v40 = vpop.f32.mrf.mxu0  ;;  %v4106_v49 = vld [vmem:[#allocation9 + $0x10] sm:$0xff] }
 0x28a   : > { %2795 = vmatpush.bf16.msra.mxu0 %v4106_v49  ;;  %v1813_v61 = vadd.f32 %v1812_v40, %v5136_v56 }
 0x28b   : > { %v2030_v11 = vadd.f32 %v5188_v58, %v1978_v45 }
 0x28d   : > { %v2070_v47 = vmax.f32 %v2030_v11, 0.0  ;;  %v2035_v11 = vadd.f32 %v5185_v5, %v1808_v14 }
 0x28e   : > { %v1920_v16 = vpop.f32.mrf.mxu2 }
 0x28f   : > { %v1979_v24 = vpop.f32.mrf.mxu3  ;;  %v2101_v28 = vpack.c.bf16 %v2070_v47, %v2069_v57  ;;  %v1921_v27 = vadd.f32 %v1920_v16, %v1862_v38 }
 0x290   : > { %v1864_v50 = vpop.f32.mrf.mxu1  ;;  %v4053_v53 = vld [vmem:[#allocation2 + $0x34] sm:$0xf0]  ;;  %v3641_v41 = vld [vmem:[#allocation2 + $0x38] sm:$0xf0] }
 0x291   : > { %2121 = vst [vmem:[#allocation2 + $0x40] sm:$0xff] %v2101_v28  ;;  %v1980_v21 = vadd.f32 %v1979_v24, %v1921_v27  ;;  %v3640_v42 = vor.u32 %v4053_v53, %v3639_v60  ;;  %v3644_v25 = vor.u32 %v4052_v39, %v3641_v41  ;;  %v1865_v54 = vadd.f32 %v1864_v50, %v5104_v23  ;;  %v1815_v27 = vpop.f32.mrf.mxu0 }
 0x292   : > { %v2037_v39 = vadd.f32 %v5185_v5, %v1811_v29 }
 0x293   : > { %v2032_v9 = vadd.f32 %v5188_v58, %v1980_v21  ;;  %2408 = vmatmul.bf16.gmra.mxu0 %v3640_v42  ;;  %2449 = vmatmul.bf16.gmra.mxu1 %v3644_v25 }
 0x294   : > { %2600 = vmatmul.bf16.gmra.mxu2 %v3640_v42  ;;  %2641 = vmatmul.bf16.gmra.mxu3 %v3644_v25  ;;  %v2077_v42 = vmax.f32 %v2037_v39, 0.0 }
 0x295   : > { %v2072_v13 = vmax.f32 %v2032_v9, 0.0 }
 0x296   : > { %v1923_v32 = vpop.f32.mrf.mxu2 }
 0x297   : > { %v1982_v2 = vpop.f32.mrf.mxu3  ;;  %v2102_v44 = vpack.c.bf16 %v2072_v13, %v2071_v62  ;;  %v1924_v48 = vadd.f32 %v1923_v32, %v1865_v54 }
 0x298   : > { %v1866_v8 = vpop.f32.mrf.mxu1  ;;  %v3647_v63 = vld [vmem:[#allocation2 + $0x40] sm:$0xf]  ;;  %v4054_v45 = vld [vmem:[#allocation2 + $0x44] sm:$0xf] }
 0x299   : > { %2122 = vst [vmem:[#allocation2 + $0x48] sm:$0xff] %v2102_v44  ;;  %v1983_v22 = vadd.f32 %v1982_v2, %v1924_v48  ;;  %v1867_v23 = vadd.f32 %v1866_v8, %v5113_v17  ;;  %v2075_v17 = vmax.f32 %v2035_v11, 0.0  ;;  %v2039_v48 = vadd.f32 %v5185_v5, %v1813_v61  ;;  %v1817_v8 = vpop.f32.mrf.mxu0 }
 0x29b   : > { %v2034_v34 = vadd.f32 %v5188_v58, %v1983_v22 }
 0x29d   : > { %v2074_v31 = vmax.f32 %v2034_v34, 0.0  ;;  %v1816_v34 = vadd.f32 %v1815_v27, %v5145_v3  ;;  %v1818_v3 = vadd.f32 %v1817_v8, %v5153_v1 }
 0x29e   : > { %v1925_v20 = vpop.f32.mrf.mxu2 }
 0x29f   : > { %v1984_v43 = vpop.f32.mrf.mxu3  ;;  %v2103_v4 = vpack.c.bf16 %v2074_v31, %v2073_v26  ;;  %v1926_v6 = vadd.f32 %v1925_v20, %v1867_v23 }
 0x2a0   : > { %v1869_v10 = vpop.f32.mrf.mxu1  ;;  %v4055_v46 = vld [vmem:[#allocation2 + $0x44] sm:$0xf0]  ;;  %v3649_v18 = vld [vmem:[#allocation2 + $0x48] sm:$0xf0] }
 0x2a1   : > { %2123 = vst [vmem:[#allocation2 + $0x50] sm:$0xff] %v2103_v4  ;;  %v1985_v57 = vadd.f32 %v1984_v43, %v1926_v6  ;;  %v3648_v12 = vor.u32 %v4055_v46, %v3647_v63  ;;  %v3652_v47 = vor.u32 %v4054_v45, %v3649_v18  ;;  %v1870_v16 = vadd.f32 %v1869_v10, %v5119_v33  ;;  %v4105_v10 = vld [vmem:[#allocation9 + $0x8] sm:$0xff]  ;;  %v1820_v63 = vpop.f32.mrf.mxu0 }
 0x2a2   : > { %v2041_v4 = vadd.f32 %v5185_v5, %v1816_v34  ;;  %2796 = vmatpush.bf16.msra.mxu0 %v4105_v10 }
 0x2a3   : > { %v2036_v51 = vadd.f32 %v5188_v58, %v1985_v57  ;;  %2412 = vmatmul.bf16.gmra.mxu0 %v3648_v12  ;;  %2453 = vmatmul.bf16.gmra.mxu1 %v3652_v47 }
 0x2a4   : > { %2604 = vmatmul.bf16.gmra.mxu2 %v3648_v12  ;;  %2645 = vmatmul.bf16.gmra.mxu3 %v3652_v47  ;;  %v2081_v45 = vmax.f32 %v2041_v4, 0.0 }
 0x2a5   : > { %v2076_v38 = vmax.f32 %v2036_v51, 0.0 }
 0x2a6   : > { %v1928_v24 = vpop.f32.mrf.mxu2 }
 0x2a7   : > { %v1987_v28 = vpop.f32.mrf.mxu3  ;;  %v2104_v50 = vpack.c.bf16 %v2076_v38, %v2075_v17  ;;  %v1929_v60 = vadd.f32 %v1928_v24, %v1870_v16  ;;  %v2043_v24 = vadd.f32 %v5185_v5, %v1818_v3 }
 0x2a8   : > { %v1871_v53 = vpop.f32.mrf.mxu1  ;;  %v3655_v54 = vld [vmem:[#allocation2 + $0x50] sm:$0xf]  ;;  %v4056_v2 = vld [vmem:[#allocation2 + $0x54] sm:$0xf] }
 0x2a9   : > { %2124 = vst [vmem:[#allocation2 + $0x58] sm:$0xff] %v2104_v50  ;;  %v1988_v41 = vadd.f32 %v1987_v28, %v1929_v60  ;;  %v1872_v33 = vadd.f32 %v1871_v53, %v5128_v7  ;;  %v2079_v7 = vmax.f32 %v2039_v48, 0.0  ;;  %v1821_v60 = vadd.f32 %v1820_v63, %v5163_v35  ;;  %v1822_v53 = vpop.f32.mrf.mxu0 }
 0x2ab   : > { %v2038_v21 = vadd.f32 %v5188_v58, %v1988_v41 }
 0x2ad   : > { %v2078_v25 = vmax.f32 %v2038_v21, 0.0 }
 0x2ae   : > { %v1930_v59 = vpop.f32.mrf.mxu2 }
 0x2af   : > { %v1989_v9 = vpop.f32.mrf.mxu3  ;;  %v2105_v62 = vpack.c.bf16 %v2078_v25, %v2077_v42  ;;  %v1931_v30 = vadd.f32 %v1930_v59, %v1872_v33  ;;  %v5417_v33 = vld [vmem:[#allocation29_spill] sm:$0xff]  ;;  %v5418_v59 = vld [vmem:[#allocation31_spill] sm:$0xff] }
 0x2b0   : > { %v1874_v13 = vpop.f32.mrf.mxu1  ;;  %v4057_v32 = vld [vmem:[#allocation2 + $0x54] sm:$0xf0]  ;;  %v3657_v44 = vld [vmem:[#allocation2 + $0x58] sm:$0xf0] }
 0x2b1   : > { %2125 = vst [vmem:[#allocation2 + $0x60] sm:$0xff] %v2105_v62  ;;  %v1990_v15 = vadd.f32 %v1989_v9, %v1931_v30  ;;  %v3656_v22 = vor.u32 %v4057_v32, %v3655_v54  ;;  %v3660_v37 = vor.u32 %v4056_v2, %v3657_v44  ;;  %v1875_v14 = vadd.f32 %v1874_v13, %v5134_v52  ;;  %v4104_v13 = vld [vmem:[#allocation9] sm:$0xff] }
 0x2b2   : > { %v1187_v9 = vadd.f32 %v5418_v59, %v5417_v33  ;;  %v2045_v62 = vadd.f32 %v5185_v5, %v1821_v60  ;;  %2797 = vmatpush.bf16.msra.mxu0 %v4104_v13 }
 0x2b3   : > { %v2040_v56 = vadd.f32 %v5188_v58, %v1990_v15  ;;  %2416 = vmatmul.bf16.gmra.mxu0 %v3656_v22  ;;  %2457 = vmatmul.bf16.gmra.mxu1 %v3660_v37 }
 0x2b4   : > { %2608 = vmatmul.bf16.gmra.mxu2 %v3656_v22  ;;  %2649 = vmatmul.bf16.gmra.mxu3 %v3660_v37  ;;  %v1246_v54 = vadd.f32 %v5161_v0, %v1187_v9  ;;  %v2085_v32 = vmax.f32 %v2045_v62, 0.0 }
 0x2b5   : > { %v2080_v26 = vmax.f32 %v2040_v56, 0.0  ;;  %v1825_v56 = vpop.f32.mrf.mxu0 }
 0x2b6   : > { %v1933_v40 = vpop.f32.mrf.mxu2 }
 0x2b7   : > { %v1992_v31 = vpop.f32.mrf.mxu3  ;;  %v2106_v23 = vpack.c.bf16 %v2080_v26, %v2079_v7  ;;  %v1934_v20 = vadd.f32 %v1933_v40, %v1875_v14 }
 0x2b8   : > { %v1876_v43 = vpop.f32.mrf.mxu1  ;;  %v3663_v17 = vld [vmem:[#allocation2 + $0x60] sm:$0xf]  ;;  %v4058_v38 = vld [vmem:[#allocation2 + $0x64] sm:$0xf] }
 0x2b9   : > { %2126 = vst [vmem:[#allocation2 + $0x68] sm:$0xff] %v2106_v23  ;;  %v1993_v6 = vadd.f32 %v1992_v31, %v1934_v20  ;;  %v1877_v52 = vadd.f32 %v1876_v43, %v5143_v55  ;;  %v2083_v55 = vmax.f32 %v2043_v24, 0.0 }
 0x2bb   : > { %v2042_v46 = vadd.f32 %v5188_v58, %v1993_v6 }
 0x2bd   : > { %v2082_v18 = vmax.f32 %v2042_v46, 0.0  ;;  %v1827_v63 = vpop.f32.mrf.mxu0 }
 0x2be   : > { %v1935_v11 = vpop.f32.mrf.mxu2 }
 0x2bf   : > { %v1994_v57 = vpop.f32.mrf.mxu3  ;;  %v2107_v12 = vpack.c.bf16 %v2082_v18, %v2081_v45  ;;  %v1936_v47 = vadd.f32 %v1935_v11, %v1877_v52 }
 0x2c0   : > { %v1879_v51 = vpop.f32.mrf.mxu1  ;;  %v4059_v29 = vld [vmem:[#allocation2 + $0x64] sm:$0xf0]  ;;  %v3665_v16 = vld [vmem:[#allocation2 + $0x68] sm:$0xf0] }
 0x2c1   : > { %2127 = vst [vmem:[#allocation2 + $0x70] sm:$0xff] %v2107_v12  ;;  %v1995_v28 = vadd.f32 %v1994_v57, %v1936_v47  ;;  %v3664_v27 = vor.u32 %v4059_v29, %v3663_v17  ;;  %v3668_v50 = vor.u32 %v4058_v38, %v3665_v16  ;;  %v1880_v41 = vadd.f32 %v1879_v51, %v5151_v36  ;;  %v3823_v51 = vld [vmem:[%s4581_s30 + $0x1c] sm:$0xf]  ;;  %v4096_v17 = vld [vmem:[%s4581_s30 + $0x24] sm:$0xf0] }
 0x2c2   : > { %v1823_v36 = vadd.f32 %v1822_v53, %v5168_v19  ;;  %v3824_v16 = vor.u32 %v4096_v17, %v3823_v51 }
 0x2c3   : > { %v2044_v1 = vadd.f32 %v5188_v58, %v1995_v28  ;;  %2420 = vmatmul.bf16.gmra.mxu0 %v3664_v27  ;;  %2461 = vmatmul.bf16.gmra.mxu1 %v3668_v50 }
 0x2c4   : > { %2612 = vmatmul.bf16.gmra.mxu2 %v3664_v27  ;;  %2653 = vmatmul.bf16.gmra.mxu3 %v3668_v50  ;;  %v2047_v0 = vadd.f32 %v5185_v5, %v1823_v36  ;;  %v4098_v36 = vld [vmem:[%s4581_s30 + $0x54] sm:$0xf0] }
 0x2c5   : > { %v2084_v39 = vmax.f32 %v2044_v1, 0.0 }
 0x2c6   : > { %v1938_v49 = vpop.f32.mrf.mxu2  ;;  %v2087_v20 = vmax.f32 %v2047_v0, 0.0  ;;  %v3835_v0 = vld [vmem:[%s4581_s30 + $0x64] sm:$0xf] }
 0x2c7   : > { %v1997_v21 = vpop.f32.mrf.mxu3  ;;  %v2108_v42 = vpack.c.bf16 %v2084_v39, %v2083_v55  ;;  %v1939_v61 = vadd.f32 %v1938_v49, %v1880_v41  ;;  %v3827_v41 = vld [vmem:[%s4581_s30 + $0x34] sm:$0xf]  ;;  %v4097_v49 = vld [vmem:[%s4581_s30 + $0x3c] sm:$0xf0] }
 0x2c8   : > { %v1881_v25 = vpop.f32.mrf.mxu1  ;;  %v3671_v37 = vld [vmem:[#allocation2 + $0x70] sm:$0xf]  ;;  %v4060_v26 = vld [vmem:[#allocation2 + $0x74] sm:$0xf] }
 0x2c9   : > { %2128 = vst [vmem:[#allocation2 + $0x78] sm:$0xff] %v2108_v42  ;;  %v1998_v30 = vadd.f32 %v1997_v21, %v1939_v61  ;;  %v1882_v44 = vadd.f32 %v1881_v25, %v1246_v54  ;;  %v3828_v61 = vor.u32 %v4097_v49, %v3827_v41 }
 0x2cb   : > { %v2046_v35 = vadd.f32 %v5188_v58, %v1998_v30 }
 0x2cd   : > { %v2086_v2 = vmax.f32 %v2046_v35, 0.0 }
 0x2ce   : > { %v1940_v48 = vpop.f32.mrf.mxu2 }
 0x2cf   : > { %v1999_v8 = vpop.f32.mrf.mxu3  ;;  %v2109_v15 = vpack.c.bf16 %v2086_v2, %v2085_v32  ;;  %v1941_v22 = vadd.f32 %v1940_v48, %v1882_v44  ;;  %v3831_v32 = vld [vmem:[%s4581_s30 + $0x4c] sm:$0xf] }
 0x2d0   : > { %v1884_v7 = vpop.f32.mrf.mxu1  ;;  %v4061_v34 = vld [vmem:[#allocation2 + $0x74] sm:$0xf0]  ;;  %v3673_v14 = vld [vmem:[#allocation2 + $0x78] sm:$0xf0]  ;;  %v3832_v48 = vor.u32 %v4098_v36, %v3831_v32 }
 0x2d1   : > { %2129 = vst [vmem:[#allocation2 + $0x80] sm:$0xff] %v2109_v15  ;;  %v2000_v40 = vadd.f32 %v1999_v8, %v1941_v22  ;;  %v3672_v31 = vor.u32 %v4061_v34, %v3671_v37  ;;  %v3676_v23 = vor.u32 %v4060_v26, %v3673_v14 }
 0x2d3   : > { %v2048_v19 = vadd.f32 %v5188_v58, %v2000_v40  ;;  %2424 = vmatmul.bf16.gmra.mxu0 %v3672_v31  ;;  %2465 = vmatmul.bf16.gmra.mxu1 %v3676_v23  ;;  %v4099_v40 = vld [vmem:[%s4581_s30 + $0x6c] sm:$0xf0] }
 0x2d4   : > { %2616 = vmatmul.bf16.gmra.mxu2 %v3672_v31  ;;  %2657 = vmatmul.bf16.gmra.mxu3 %v3676_v23 }
 0x2d5   : > { %v2088_v43 = vmax.f32 %v2048_v19, 0.0  ;;  %v3836_v19 = vor.u32 %v4099_v40, %v3835_v0 }
 0x2d6   : > { %v1943_v4 = vpop.f32.mrf.mxu2 }
 0x2d7   : > { %v2002_v6 = vpop.f32.mrf.mxu3  ;;  %v2110_v10 = vpack.c.bf16 %v2088_v43, %v2087_v20 }
 0x2d8   : > { %v1886_v5 = vpop.f32.mrf.mxu1  ;;  %v3679_v3 = vld [vmem:[#allocation2 + $0x80] sm:$0xf]  ;;  %v4078_v52 = vld [vmem:[#allocation2 + $0x84] sm:$0xf] }
 0x2d9   : > { %2130 = vst [vmem:[#allocation2 + $0x88] sm:$0xff] %v2110_v10 }
 0x2de   : > { %v1945_v46 = vpop.f32.mrf.mxu2 }
 0x2df   : > { %v2004_v45 = vpop.f32.mrf.mxu3 }
 0x2e0   : > { %v4079_v18 = vld [vmem:[#allocation2 + $0x84] sm:$0xf0]  ;;  %v3681_v58 = vld [vmem:[#allocation2 + $0x88] sm:$0xf0] }
 0x2e1   : > { %v3680_v11 = vor.u32 %v4079_v18, %v3679_v3  ;;  %v3684_v57 = vor.u32 %v4078_v52, %v3681_v58  ;;  %v3839_v3 = vld [vmem:[%s4581_s30 + $0x7c] sm:$0xf]  ;;  %v4100_v18 = vld [vmem:[%s4581_s30 + $0x84] sm:$0xf0] }
 0x2e3   : > { %2428 = vmatmul.bf16.gmra.mxu0 %v3680_v11  ;;  %2469 = vmatmul.bf16.gmra.mxu1 %v3684_v57  ;;  %v3840_v11 = vor.u32 %v4100_v18, %v3839_v3 }
 0x2e6   : > { %v2589_v12 = vpop.f32.mrf.mxu2 }
 0x2e7   : > { %v2630_v47 = vpop.f32.mrf.mxu3 }
 0x2ee   : > { %v2591_v29 = vpop.f32.mrf.mxu2 }
 0x2ef   : > { %v2632_v38 = vpop.f32.mrf.mxu3 }
 0x2f0   : > { %v2401_v24 = vpop.f32.mrf.mxu0  ;;  %v2442_v28 = vpop.f32.mrf.mxu1 }
 0x2f1   : > { %v2443_v27 = vadd.f32 %v2442_v28, %v2401_v24  ;;  %v3843_v28 = vld [vmem:[%s4581_s30 + $0x94] sm:$0xf] }
 0x2f3   : > { %v2590_v50 = vadd.f32 %v2589_v12, %v2443_v27  ;;  %2798 = vmatmul.bf16.vlgmr.msra.gmra.mxu0 %v3824_v16  ;;  %v4101_v27 = vld [vmem:[%s4581_s30 + $0x9c] sm:$0xf0] }
 0x2f5   : > { %v5283_v1 = vadd.f32 %v2630_v47, %v2590_v50 }
 0x2f7   : > { %v2593_v55 = vpop.f32.mrf.mxu2  ;;  %v2634_v60 = vpop.f32.mrf.mxu3 }
 0x2f8   : > { %v2403_v53 = vpop.f32.mrf.mxu0  ;;  %v2444_v39 = vpop.f32.mrf.mxu1 }
 0x2ff   : > { %v2595_v21 = vpop.f32.mrf.mxu2  ;;  %v2636_v42 = vpop.f32.mrf.mxu3 }
 0x300   : > { %v2405_v25 = vpop.f32.mrf.mxu0  ;;  %v2446_v33 = vpop.f32.mrf.mxu1 }
 0x301   : > { %v2447_v59 = vadd.f32 %v2446_v33, %v2405_v25 }
 0x303   : > { %v2594_v9 = vadd.f32 %v2593_v55, %v2447_v59  ;;  %2802 = vmatmul.bf16.gmra.mxu0 %v3828_v61  ;;  %v3847_v59 = vld [vmem:[%s4581_s30 + $0xac] sm:$0xf] }
 0x305   : > { %v5287_v62 = vadd.f32 %v2634_v60, %v2594_v9  ;;  %v3844_v60 = vor.u32 %v4101_v27, %v3843_v28  ;;  %v4102_v9 = vld [vmem:[%s4581_s30 + $0xb4] sm:$0xf0] }
 0x307   : > { %v2597_v30 = vpop.f32.mrf.mxu2  ;;  %v2638_v13 = vpop.f32.mrf.mxu3 }
 0x308   : > { %v2407_v54 = vpop.f32.mrf.mxu0  ;;  %v2448_v35 = vpop.f32.mrf.mxu1 }
 0x309   : > { %v3848_v54 = vor.u32 %v4102_v9, %v3847_v59 }
 0x30f   : > { %v2599_v2 = vpop.f32.mrf.mxu2  ;;  %v2640_v44 = vpop.f32.mrf.mxu3 }
 0x310   : > { %v2409_v8 = vpop.f32.mrf.mxu0  ;;  %v2450_v15 = vpop.f32.mrf.mxu1 }
 0x311   : > { %v2451_v22 = vadd.f32 %v2450_v15, %v2409_v8 }
 0x313   : > { %v2598_v37 = vadd.f32 %v2597_v30, %v2451_v22  ;;  %2806 = vmatmul.bf16.gmra.mxu0 %v3832_v48 }
 0x315   : > { %v5291_v56 = vadd.f32 %v2638_v13, %v2598_v37  ;;  %v3851_v37 = vld [vmem:[%s4581_s30 + $0xc4] sm:$0xf] }
 0x317   : > { %v2601_v7 = vpop.f32.mrf.mxu2  ;;  %v2642_v34 = vpop.f32.mrf.mxu3 }
 0x318   : > { %v2411_v26 = vpop.f32.mrf.mxu0  ;;  %v2452_v14 = vpop.f32.mrf.mxu1 }
 0x31f   : > { %v2603_v31 = vpop.f32.mrf.mxu2  ;;  %v2644_v23 = vpop.f32.mrf.mxu3 }
 0x320   : > { %v2413_v20 = vpop.f32.mrf.mxu0  ;;  %v2454_v43 = vpop.f32.mrf.mxu1 }
 0x321   : > { %v2455_v4 = vadd.f32 %v2454_v43, %v2413_v20 }
 0x323   : > { %v2602_v6 = vadd.f32 %v2601_v7, %v2455_v4  ;;  %2810 = vmatmul.bf16.gmra.mxu0 %v3836_v19  ;;  %v4103_v7 = vld [vmem:[%s4581_s30 + $0xcc] sm:$0xf0]  ;;  %v4225_v4 = vld [vmem:[%s5368_s5] ss:$0 sm:$0xff] }
 0x324   : > { %v3852_v14 = vor.u32 %v4103_v7, %v3851_v37 }
 0x325   : > { %v5295_v10 = vadd.f32 %v2642_v34, %v2602_v6 }
 0x327   : > { %v2605_v63 = vpop.f32.mrf.mxu2  ;;  %v2646_v5 = vpop.f32.mrf.mxu3 }
 0x328   : > { %v2415_v46 = vpop.f32.mrf.mxu0  ;;  %v2456_v45 = vpop.f32.mrf.mxu1 }
 0x32f   : > { %v2607_v52 = vpop.f32.mrf.mxu2  ;;  %v2648_v58 = vpop.f32.mrf.mxu3 }
 0x330   : > { %v2417_v57 = vpop.f32.mrf.mxu0  ;;  %v2458_v12 = vpop.f32.mrf.mxu1 }
 0x331   : > { %v2459_v47 = vadd.f32 %v2458_v12, %v2417_v57 }
 0x333   : > { %v2606_v51 = vadd.f32 %v2605_v63, %v2459_v47  ;;  %2814 = vmatmul.bf16.gmra.mxu0 %v3840_v11 }
 0x335   : > { %v5299_v17 = vadd.f32 %v2646_v5, %v2606_v51 }
 0x337   : > { %v2609_v29 = vpop.f32.mrf.mxu2  ;;  %v2650_v38 = vpop.f32.mrf.mxu3 }
 0x338   : > { %v2419_v16 = vpop.f32.mrf.mxu0  ;;  %v2460_v24 = vpop.f32.mrf.mxu1 }
 0x33f   : > { %v2611_v50 = vpop.f32.mrf.mxu2  ;;  %v2652_v55 = vpop.f32.mrf.mxu3 }
 0x340   : > { %v2421_v53 = vpop.f32.mrf.mxu0  ;;  %v2462_v39 = vpop.f32.mrf.mxu1 }
 0x341   : > { %v2463_v41 = vadd.f32 %v2462_v39, %v2421_v53 }
 0x343   : > { %v2610_v49 = vadd.f32 %v2609_v29, %v2463_v41  ;;  %2818 = vmatmul.bf16.gmra.mxu0 %v3844_v60 }
 0x345   : > { %v5303_v21 = vadd.f32 %v2650_v38, %v2610_v49 }
 0x347   : > { %v2613_v42 = vpop.f32.mrf.mxu2  ;;  %v2654_v61 = vpop.f32.mrf.mxu3 }
 0x348   : > { %v2423_v25 = vpop.f32.mrf.mxu0  ;;  %v2464_v33 = vpop.f32.mrf.mxu1 }
 0x34f   : > { %v2615_v30 = vpop.f32.mrf.mxu2  ;;  %v2656_v13 = vpop.f32.mrf.mxu3 }
 0x350   : > { %v2425_v35 = vpop.f32.mrf.mxu0  ;;  %v2466_v32 = vpop.f32.mrf.mxu1 }
 0x351   : > { %v2467_v36 = vadd.f32 %v2466_v32, %v2425_v35 }
 0x353   : > { %v2614_v2 = vadd.f32 %v2613_v42, %v2467_v36  ;;  %2822 = vmatmul.bf16.gmra.mxu0 %v3848_v54 }
 0x355   : > { %v2655_v44 = vadd.f32 %v2654_v61, %v2614_v2 }
 0x357   : > { %v2617_v48 = vpop.f32.mrf.mxu2  ;;  %v2658_v8 = vpop.f32.mrf.mxu3 }
 0x358   : > { %v2427_v15 = vpop.f32.mrf.mxu0  ;;  %v2468_v22 = vpop.f32.mrf.mxu1 }
 0x35f   : > { %v2619_v34 = vpop.f32.mrf.mxu2  ;;  %v2660_v26 = vpop.f32.mrf.mxu3 }
 0x360   : > { %v2429_v0 = vpop.f32.mrf.mxu0  ;;  %v2470_v40 = vpop.f32.mrf.mxu1 }
 0x361   : > { %v2471_v31 = vadd.f32 %v2470_v40, %v2429_v0 }
 0x363   : > { %v2618_v23 = vadd.f32 %v2617_v48, %v2471_v31  ;;  %2826 = vmatmul.bf16.gmra.mxu0 %v3852_v14 }
 0x365   : > { %v2659_v19 = vadd.f32 %v2658_v8, %v2618_v23 }
 0x368   : > { %v2431_v20 = vpop.f32.mrf.mxu0  ;;  %v2472_v43 = vpop.f32.mrf.mxu1 }
 0x370   : > { %v2799_v6 = vpop.f32.mrf.mxu0 }
 0x371   : > { %v2831_v63 = vadd.f32 %v2799_v6, %v5283_v1 }
 0x373   : > { %v2843_v5 = vadd.f32 %v4225_v4, %v2831_v63 }
 0x375   : > { %v2851_v46 = vmax.f32 %v2843_v5, 0.0 }
 0x377   : > { %2859 = vst [vmem:[%s5314_s9] sm:$0xff] %v2851_v46 }
 0x378   : > { %v2801_v45 = vpop.f32.mrf.mxu0 }
 0x380   : > { %v2803_v3 = vpop.f32.mrf.mxu0 }
 0x381   : > { %v2832_v18 = vadd.f32 %v2803_v3, %v5287_v62 }
 0x383   : > { %v2844_v52 = vadd.f32 %v4225_v4, %v2832_v18 }
 0x385   : > { %v2852_v58 = vmax.f32 %v2844_v52, 0.0 }
 0x387   : > { %2860 = vst [vmem:[%s5314_s9 + $0x8] sm:$0xff] %v2852_v58 }
 0x388   : > { %v2805_v11 = vpop.f32.mrf.mxu0 }
 0x390   : > { %v2807_v57 = vpop.f32.mrf.mxu0 }
 0x391   : > { %v2833_v1 = vadd.f32 %v2807_v57, %v5291_v56 }
 0x393   : > { %v2845_v12 = vadd.f32 %v4225_v4, %v2833_v1 }
 0x395   : > { %v2853_v47 = vmax.f32 %v2845_v12, 0.0 }
 0x397   : > { %2861 = vst [vmem:[%s5314_s9 + $0x10] sm:$0xff] %v2853_v47 }
 0x398   : > { %v2809_v51 = vpop.f32.mrf.mxu0 }
 0x3a0   : > { %v2811_v29 = vpop.f32.mrf.mxu0 }
 0x3a1   : > { %v2834_v38 = vadd.f32 %v2811_v29, %v5295_v10 }
 0x3a3   : > { %v2846_v16 = vadd.f32 %v4225_v4, %v2834_v38 }
 0x3a5   : > { %v2854_v24 = vmax.f32 %v2846_v16, 0.0 }
 0x3a7   : > { %2862 = vst [vmem:[%s5314_s9 + $0x18] sm:$0xff] %v2854_v24 }
 0x3a8   : > { %v2813_v62 = vpop.f32.mrf.mxu0 }
 0x3b0   : > { %v2815_v28 = vpop.f32.mrf.mxu0 }
 0x3b1   : > { %v2835_v27 = vadd.f32 %v2815_v28, %v5299_v17 }
 0x3b3   : > { %v2847_v50 = vadd.f32 %v4225_v4, %v2835_v27 }
 0x3b5   : > { %v2855_v55 = vmax.f32 %v2847_v50, 0.0 }
 0x3b7   : > { %2863 = vst [vmem:[%s5314_s9 + $0x20] sm:$0xff] %v2855_v55 }
 0x3b8   : > { %v2817_v56 = vpop.f32.mrf.mxu0 }
 0x3c0   : > { %v2819_v60 = vpop.f32.mrf.mxu0 }
 0x3c1   : > { %v2836_v53 = vadd.f32 %v2819_v60, %v5303_v21 }
 0x3c3   : > { %v2848_v39 = vadd.f32 %v4225_v4, %v2836_v53 }
 0x3c5   : > { %v2856_v41 = vmax.f32 %v2848_v39, 0.0 }
 0x3c7   : > { %2864 = vst [vmem:[%s5314_s9 + $0x28] sm:$0xff] %v2856_v41 }
 0x3c8   : > { %v2821_v10 = vpop.f32.mrf.mxu0 }
 0x3d0   : > { %v2823_v49 = vpop.f32.mrf.mxu0 }
 0x3d1   : > { %v2837_v42 = vadd.f32 %v2823_v49, %v2655_v44 }
 0x3d3   : > { %v2849_v61 = vadd.f32 %v4225_v4, %v2837_v42 }
 0x3d5   : > { %v2857_v25 = vmax.f32 %v2849_v61, 0.0 }
 0x3d7   : > { %2865 = vst [vmem:[%s5314_s9 + $0x30] sm:$0xff] %v2857_v25 }
 0x3d8   : > { %v2825_v17 = vpop.f32.mrf.mxu0 }
 0x3e0   : > { %v2827_v21 = vpop.f32.mrf.mxu0 }
 0x3e1   : > { %v2838_v33 = vadd.f32 %v2827_v21, %v2659_v19 }
 0x3e3   : > { %v2850_v59 = vadd.f32 %v4225_v4, %v2838_v33 }
 0x3e5   : > { %v2858_v9 = vmax.f32 %v2850_v59, 0.0 }
 0x3e7   : > { %2866 = vst [vmem:[%s5314_s9 + $0x38] sm:$0xff] %v2858_v9 }
 0x3e8   : > { %v2829_v30 = vpop.f32.mrf.mxu0 }
 0x3e9   : > { %4373 = shalt.err (!%p4370_p10)
}
 0x3ea   : > { %s4431_s20 = smov 128   ;;  %s4432_s29 = smov 8  }
 0x3eb   : > { %4154 = dma.vmem_to_hbm [thread:$0]  (%p4551_p7), %s2881_s19, 1024, %s2883_s16, %s2868_s17, %s4431_s20, %s4431_s20, %s4432_s29  }
 0x3ec PF: > { %s2897_s7 = sand.u32 1, %s4408_s21   ;;  %p5419_p12 = scmp.ge.s32.totalorder %s4420_s24, 2 }
 0x3ed   : > { %s2898_s9 = scalar_lea.sflag [#allocation5], %s2897_s7 }
 0x3ee   : > { %p4171_p13 = pnand %p5419_p12, %p4503_p6 }
 0x3f0   : > { %p4172_p0 = pneg %p4171_p13 }
 0x3f2   : > { %4403 = dma.done.wait (%p4172_p0), %s2898_s9, 1024  }
 0x3f3   : > { %4405 = vsyncadd (%p4172_p0), %s2898_s9, 4294966272  ;;  %p21_p3 = scmp.ge.s32.totalorder %s4537_s10, 4   ;;  %s5420_s21 = smov %s4412_s22 }
 0x3f4   : > { %s5421_s22 = smov %s4416_s23  ;;  %s5422_s23 = smov %s4547_s14 }
 0x3f5   : > { %s5423_s24 = smov %s4537_s10  ;;  %23 = sbr.rel (!%p21_p3) target bundleno = 10 (0xa), region = 103 }
 0x3fa   :  { %2904 = vsyncpa [#allocation4], 1 }
 0x3fb   :  { %2906 = vsyncpa [#allocation4 + $0x1], 1 }
 0x3fc   :  { %2907 = vsyncpa [#allocation7], 1 }
 0x3fd   :  { %2908 = vsyncpa [#allocation10], 1 }
 0x3fe   :  { %2909 = vsyncpa [#allocation5], 1 }
 0x3ff   :  { %2911 = vsyncpa [#allocation5 + $0x1], 1 }

</bundles_post_ra>
